<compile_context>
chip_gen: v7x
topology: tpu7x:2x2x1
jax: 0.10.0
libtpu: 0.0.40
codegen_flags: <defaults>
</compile_context>

<pallas_src>
import functools

import jax
import jax.numpy as jnp
from jax.experimental import pallas as pl
from jax.experimental.pallas import tpu as pltpu

EPS = 1e-5          # InstanceNorm3d default eps
NEG_SLOPE = 0.01    # LeakyReLU default negative_slope


def _round_up(v, m):
    return (v + m - 1) // m * m


def _vmem_bytes(rows, cols, dtype):
    """(sublane, 128)-tile-padded VMEM footprint of a (rows, cols) array."""
    it = jnp.dtype(dtype).itemsize
    sub = (8 * 4) // it                      # 8 rows (f32) / 16 rows (bf16)
    return (_round_up(max(int(rows), 1), sub)
            * _round_up(max(int(cols), 1), 128) * it)


def _physical_vmem_bytes():
    try:
        return int(pltpu.get_tpu_info().vmem_capacity_bytes)
    except Exception:
        return 64 * 1024 * 1024              # conservative: v7x per-TensorCore


# ---------------------------------------------------------------------------
# Fused kernel: one grid step == one batch sample.
# All arrays are channels-on-sublane / voxels-on-lane: (C, Sp).
# ---------------------------------------------------------------------------
def _bottleneck_kernel(mask_ref, x_ref, w1_ref, w2_ref, w3_ref, o_ref,
                       *, interior, hp, wp, cdt, eps, neg_slope):
    sp = x_ref.shape[2]                # padded voxel count Dp*Hp*Wp (lane axis)
    pp = w1_ref.shape[0]               # padded hidden channel count
    inv_n = 1.0 / float(interior)

    mask = mask_ref[...]               # (1, Sp) f32, 1.0 on interior voxels
    x = x_ref[0]                       # (Cin, Sp) f32, reflect-padded volume

    def inorm(y):
        # Per-channel InstanceNorm over interior voxels only (centered variance).
        mean = jnp.sum(y * mask, axis=1, keepdims=True) * inv_n       # (C, 1)
        d = (y - mean) * mask
        var = jnp.sum(d * d, axis=1, keepdims=True) * inv_n
        return (y - mean) * jax.lax.rsqrt(var + eps)

    def lrelu(y):
        return jnp.where(y >= 0, y, neg_slope * y)

    # ---- stage 1: 1x1x1 conv -> IN -> LeakyReLU (pointwise, so the pad ring
    # holds exactly the reflect-padded stage-1 output).
    y1 = jnp.dot(w1_ref[...], x.astype(cdt), preferred_element_type=jnp.float32)
    a1 = lrelu(inorm(y1))                                   # (Pp, Sp) f32
    a1c = a1.astype(cdt)

    # ---- stage 2: 3x3x3 conv as ONE K=27*Pp contraction over lane-rolled taps.
    # Interior voxels are >= M = Hp*Wp + Wp + 1 rows from either end of the
    # flattened volume, so the circular wrap of the rolls never reaches an
    # interior output; ring garbage is masked out of all later IN statistics.
    taps = []
    for kd in (-1, 0, 1):
        for kh in (-1, 0, 1):
            for kw in (-1, 0, 1):
                off = kd * hp * wp + kh * wp + kw
                if off == 0:
                    taps.append(a1c)
                else:
                    taps.append(pltpu.roll(a1c, shift=(-off) % sp, axis=1))
    taps = jnp.concatenate(taps, axis=0)                    # (27*Pp, Sp) cdt
    y2 = jnp.dot(w2_ref[...], taps, preferred_element_type=jnp.float32)
    a2 = lrelu(inorm(y2))                                   # (Pp, Sp) f32

    # ---- stage 3: 1x1x1 conv -> IN -> residual add -> LeakyReLU
    y3 = jnp.dot(w3_ref[...], a2.astype(cdt),
                 preferred_element_type=jnp.float32)        # (Cout, Sp)
    o_ref[0] = lrelu(inorm(y3) + x)


# ---------------------------------------------------------------------------
# Wrapper: layout plumbing (NCDHW in/out, no transposes) + one pallas_call.
# ---------------------------------------------------------------------------
def bottleneck_forward(x_ncdhw, params, *, compute_dtype=jnp.bfloat16):
    """Bottleneck forward (stride=1, downsample=None).  NCDHW f32 in/out."""
    N, Cin, D, H, W = x_ncdhw.shape
    w1, w2, w3 = params["w1"], params["w2"], params["w3"]
    planes = w1.shape[0]
    cout = w3.shape[0]
    if cout != Cin:
        raise ValueError("residual add requires inplanes == planes * expansion")

    Dp, Hp, Wp = D + 2, H + 2, W + 2
    Sp, S = Dp * Hp * Wp, D * H * W
    Pp = _round_up(planes, 16)   # hidden channels padded to a full sublane tile

    # ReflectionPad3d(1) + flatten voxels, staying channels-first (NC,Sp).
    xp = jnp.pad(x_ncdhw, ((0, 0), (0, 0), (1, 1), (1, 1), (1, 1)),
                 mode="reflect").reshape(N, Cin, Sp).astype(jnp.float32)

    # Interior mask (1.0 on original voxels, 0.0 on the pad ring), lane-dense.
    md = ((jnp.arange(Dp) >= 1) & (jnp.arange(Dp) <= D)).astype(jnp.float32)
    mh = ((jnp.arange(Hp) >= 1) & (jnp.arange(Hp) <= H)).astype(jnp.float32)
    mw = ((jnp.arange(Wp) >= 1) & (jnp.arange(Wp) <= W)).astype(jnp.float32)
    mask = (md[:, None, None] * mh[None, :, None]
            * mw[None, None, :]).reshape(1, Sp)

    # Weights as (C_out, C_in)-style matmul operands; padded channels stay 0.
    w1m = jnp.zeros((Pp, Cin), compute_dtype).at[:planes, :].set(
        w1.reshape(planes, Cin).astype(compute_dtype))
    w2m = jnp.zeros((Pp, 27, Pp), compute_dtype).at[:planes, :, :planes].set(
        jnp.transpose(w2, (0, 2, 3, 4, 1)).reshape(planes, 27, planes)
        .astype(compute_dtype)).reshape(Pp, 27 * Pp)
    w3m = jnp.zeros((cout, Pp), compute_dtype).at[:, :planes].set(
        w3.reshape(cout, planes).astype(compute_dtype))

    # Tile-padding-aware VMEM estimate for one grid step.
    est = (
        2 * _vmem_bytes(Cin, Sp, jnp.float32)              # x blocks (2-buffered)
        + 2 * _vmem_bytes(cout, Sp, jnp.float32)           # out blocks
        + 2 * _vmem_bytes(1, Sp, jnp.float32)              # mask blocks
        + 2 * (_vmem_bytes(Pp, Cin, compute_dtype)
               + _vmem_bytes(Pp, 27 * Pp, compute_dtype)
               + _vmem_bytes(cout, Pp, compute_dtype))     # weight blocks
        + _vmem_bytes(Cin, Sp, compute_dtype)              # x cast
        + 3 * _vmem_bytes(Pp, Sp, jnp.float32)             # a1 / a2 / f32 temps
        + 2 * _vmem_bytes(Pp, Sp, compute_dtype)           # a1c / a2c
        + _vmem_bytes(27 * Pp, Sp, compute_dtype)          # stacked taps (im2col)
        + 2 * _vmem_bytes(cout, Sp, jnp.float32)           # y3 + output temp
    )
    budget = _physical_vmem_bytes() - 12 * 1024 * 1024
    if est > budget:
        # TODO(synk): S-tiled two-pass InstanceNorm path for larger volumes.
        raise NotImplementedError(
            f"per-sample working set ~{est / 2**20:.1f} MiB exceeds VMEM budget")
    vmem_limit = int(min(budget, max(32 * 1024 * 1024, 2 * est)))

    kernel = functools.partial(
        _bottleneck_kernel, interior=S, hp=Hp, wp=Wp, cdt=compute_dtype,
        eps=EPS, neg_slope=NEG_SLOPE)

    out_flat = pl.pallas_call(
        kernel,
        out_shape=jax.ShapeDtypeStruct((N, cout, Sp), jnp.float32),
        grid=(N,),
        in_specs=[
            pl.BlockSpec((1, Sp), lambda n: (0, 0)),            # interior mask
            pl.BlockSpec((1, Cin, Sp), lambda n: (n, 0, 0)),    # padded input
            pl.BlockSpec((Pp, Cin), lambda n: (0, 0)),          # w1
            pl.BlockSpec((Pp, 27 * Pp), lambda n: (0, 0)),      # w2 (im2col form)
            pl.BlockSpec((cout, Pp), lambda n: (0, 0)),         # w3
        ],
        out_specs=pl.BlockSpec((1, cout, Sp), lambda n: (n, 0, 0)),
        input_output_aliases={1: 0},   # residual/x HBM buffer reused for output
        compiler_params=pltpu.CompilerParams(
            dimension_semantics=("parallel",),
            vmem_limit_bytes=vmem_limit),
    )(mask, xp, w1m, w2m, w3m)

    # Interior slice; already NCDHW (no transpose).
    return out_flat.reshape(N, cout, Dp, Hp, Wp)[:, :, 1:D + 1, 1:H + 1, 1:W + 1]


# ---------------------------------------------------------------------------
# Pure-JAX reference (NCDHW, matches the PyTorch module semantics).
# ---------------------------------------------------------------------------
def _instance_norm(y):
    mean = y.mean(axis=(2, 3, 4), keepdims=True)
    var = y.var(axis=(2, 3, 4), keepdims=True)   # biased, matches InstanceNorm3d
    return (y - mean) / jnp.sqrt(var + EPS)


def _lrelu(y):
    return jnp.where(y >= 0, y, NEG_SLOPE * y)


def bottleneck_reference(x, params):
    dn = ("NCDHW", "OIDHW", "NCDHW")
    out = jax.lax.conv_general_dilated(x, params["w1"], (1, 1, 1), "VALID",
                                       dimension_numbers=dn)
    out = _lrelu(_instance_norm(out))
    outp = jnp.pad(out, ((0, 0), (0, 0), (1, 1), (1, 1), (1, 1)), mode="reflect")
    out = jax.lax.conv_general_dilated(outp, params["w2"], (1, 1, 1), "VALID",
                                       dimension_numbers=dn)
    out = _lrelu(_instance_norm(out))
    out = jax.lax.conv_general_dilated(out, params["w3"], (1, 1, 1), "VALID",
                                       dimension_numbers=dn)
    out = _instance_norm(out) + x
    return _lrelu(out)


# ---------------------------------------------------------------------------
if __name__ == "__main__":
    key = jax.random.PRNGKey(0)
    k1, k2, k3, kx = jax.random.split(key, 4)

    # expansion = 8, so inplanes = planes * 8 for the residual to type-check.
    N, planes = 2, 2
    inplanes = planes * 8            # 16
    D = H = W = 6

    params = {
        "w1": 0.1 * jax.random.normal(k1, (planes, inplanes, 1, 1, 1), jnp.float32),
        "w2": 0.1 * jax.random.normal(k2, (planes, planes, 3, 3, 3), jnp.float32),
        "w3": 0.1 * jax.random.normal(k3, (planes * 8, planes, 1, 1, 1), jnp.float32),
    }
    x = jax.random.normal(kx, (N, inplanes, D, H, W), jnp.float32)

    ref = bottleneck_reference(x, params)

    # Exact-path check (f32 matmul operands): validates the fused structure.
    fwd_f32 = jax.jit(functools.partial(bottleneck_forward, params=params,
                                        compute_dtype=jnp.float32))
    out_f32 = fwd_f32(x)
    jax.block_until_ready(out_f32)
    assert out_f32.shape == (N, planes * 8, D, H, W), out_f32.shape
    err32 = float(jnp.max(jnp.abs(out_f32 - ref)))
    assert err32 < 1e-2, f"f32 path max abs diff vs reference: {err32}"

    # Fast path (bf16 MXU operands, f32 accumulation / norm / residual).
    fwd_bf16 = jax.jit(functools.partial(bottleneck_forward, params=params))
    out_bf16 = fwd_bf16(x)
    jax.block_until_ready(out_bf16)
    errbf = float(jnp.max(jnp.abs(out_bf16 - ref)))
    assert errbf < 1e-1, f"bf16 path max abs diff vs reference: {errbf}"

    print("KERNEL_OK")
</pallas_src>

<mosaic_0001>
module attributes {stable_mosaic.version = 11 : i64} {
  func.func @_bottleneck_kernel(%arg0: i32, %arg1: memref<1x512xf32, #tpu.memory_space<vmem>>, %arg2: memref<1x16x512xf32, #tpu.memory_space<vmem>>, %arg3: memref<16x16xf32, #tpu.memory_space<vmem>>, %arg4: memref<16x432xf32, #tpu.memory_space<vmem>>, %arg5: memref<16x16xf32, #tpu.memory_space<vmem>>, %arg6: memref<1x16x512xf32, #tpu.memory_space<vmem>>) attributes {dimension_semantics = [#tpu.dimension_semantics<parallel>], iteration_bounds = array<i64: 2>, scalar_prefetch = 0 : i64, scratch_operands = 0 : i64, tpu.core_type = #tpu.core_type<tc>, window_params = [{pipeline_mode = #tpu.pipeline_mode<synchronous>, transform_indices = @transform_0, window_bounds = array<i64: 1, 512>}, {transform_indices = @transform_1, window_bounds = array<i64: 1, 16, 512>}, {pipeline_mode = #tpu.pipeline_mode<synchronous>, transform_indices = @transform_2, window_bounds = array<i64: 16, 16>}, {pipeline_mode = #tpu.pipeline_mode<synchronous>, transform_indices = @transform_3, window_bounds = array<i64: 16, 432>}, {pipeline_mode = #tpu.pipeline_mode<synchronous>, transform_indices = @transform_4, window_bounds = array<i64: 16, 16>}, {transform_indices = @transform_5, window_bounds = array<i64: 1, 16, 512>}]} {
    %c0 = arith.constant 0 : index
    %c0_0 = arith.constant 0 : index
    %0 = vector.load %arg1[%c0, %c0_0] : memref<1x512xf32, #tpu.memory_space<vmem>>, vector<1x512xf32>
    %c0_1 = arith.constant 0 : index
    %c0_2 = arith.constant 0 : index
    %c0_3 = arith.constant 0 : index
    %1 = vector.load %arg2[%c0_1, %c0_2, %c0_3] : memref<1x16x512xf32, #tpu.memory_space<vmem>>, vector<1x16x512xf32>
    %2 = vector.shape_cast %1 : vector<1x16x512xf32> to vector<16x512xf32>
    %c0_4 = arith.constant 0 : index
    %c0_5 = arith.constant 0 : index
    %3 = vector.load %arg3[%c0_4, %c0_5] : memref<16x16xf32, #tpu.memory_space<vmem>>, vector<16x16xf32>
    %cst = arith.constant dense<0.000000e+00> : vector<16x512xf32>
    %4 = tpu.matmul %3, %2, %cst {dimension_numbers = #tpu.dot_dimension_numbers<[1], [0], [0], [1], [0, 0, 1, 1], [], []>} : vector<16x16xf32>, vector<16x512xf32>, vector<16x512xf32> -> vector<16x512xf32>
    %5 = vector.broadcast %0 : vector<1x512xf32> to vector<16x512xf32>
    %6 = arith.mulf %4, %5 : vector<16x512xf32>
    %cst_6 = arith.constant dense<0.000000e+00> : vector<16xf32>
    %7 = vector.multi_reduction <add>, %6, %cst_6 [1] : vector<16x512xf32> to vector<16xf32>
    %8 = vector.shape_cast %7 : vector<16xf32> to vector<16x1xf32>
    %cst_7 = arith.constant 0.00462962966 : f32
    %9 = vector.broadcast %cst_7 : f32 to vector<16x1xf32>
    %10 = arith.mulf %8, %9 : vector<16x1xf32>
    %11 = vector.broadcast %10 : vector<16x1xf32> to vector<16x512xf32>
    %12 = arith.subf %4, %11 : vector<16x512xf32>
    %13 = vector.broadcast %0 : vector<1x512xf32> to vector<16x512xf32>
    %14 = arith.mulf %12, %13 : vector<16x512xf32>
    %15 = arith.mulf %14, %14 : vector<16x512xf32>
    %cst_8 = arith.constant dense<0.000000e+00> : vector<16xf32>
    %16 = vector.multi_reduction <add>, %15, %cst_8 [1] : vector<16x512xf32> to vector<16xf32>
    %17 = vector.shape_cast %16 : vector<16xf32> to vector<16x1xf32>
    %cst_9 = arith.constant 0.00462962966 : f32
    %18 = vector.broadcast %cst_9 : f32 to vector<16x1xf32>
    %19 = arith.mulf %17, %18 : vector<16x1xf32>
    %20 = vector.broadcast %10 : vector<16x1xf32> to vector<16x512xf32>
    %21 = arith.subf %4, %20 : vector<16x512xf32>
    %cst_10 = arith.constant 9.99999974E-6 : f32
    %22 = vector.broadcast %cst_10 : f32 to vector<16x1xf32>
    %23 = arith.addf %19, %22 : vector<16x1xf32>
    %24 = math.rsqrt %23 : vector<16x1xf32>
    %25 = vector.broadcast %24 : vector<16x1xf32> to vector<16x512xf32>
    %26 = arith.mulf %21, %25 : vector<16x512xf32>
    %cst_11 = arith.constant 0.000000e+00 : f32
    %27 = vector.broadcast %cst_11 : f32 to vector<16x512xf32>
    %28 = arith.cmpf oge, %26, %27 : vector<16x512xf32>
    %cst_12 = arith.constant 0.00999999977 : f32
    %29 = vector.broadcast %cst_12 : f32 to vector<16x512xf32>
    %30 = arith.mulf %29, %26 : vector<16x512xf32>
    %31 = arith.select %28, %26, %30 : vector<16x512xi1>, vector<16x512xf32>
    %c73_i32 = arith.constant 73 : i32
    %32 = tpu.dynamic_rotate %31 by %c73_i32 dim 1 : vector<16x512xf32>, i32 -> vector<16x512xf32>
    %c72_i32 = arith.constant 72 : i32
    %33 = tpu.dynamic_rotate %31 by %c72_i32 dim 1 : vector<16x512xf32>, i32 -> vector<16x512xf32>
    %c71_i32 = arith.constant 71 : i32
    %34 = tpu.dynamic_rotate %31 by %c71_i32 dim 1 : vector<16x512xf32>, i32 -> vector<16x512xf32>
    %c65_i32 = arith.constant 65 : i32
    %35 = tpu.dynamic_rotate %31 by %c65_i32 dim 1 : vector<16x512xf32>, i32 -> vector<16x512xf32>
    %c64_i32 = arith.constant 64 : i32
    %36 = tpu.dynamic_rotate %31 by %c64_i32 dim 1 : vector<16x512xf32>, i32 -> vector<16x512xf32>
    %c63_i32 = arith.constant 63 : i32
    %37 = tpu.dynamic_rotate %31 by %c63_i32 dim 1 : vector<16x512xf32>, i32 -> vector<16x512xf32>
    %c57_i32 = arith.constant 57 : i32
    %38 = tpu.dynamic_rotate %31 by %c57_i32 dim 1 : vector<16x512xf32>, i32 -> vector<16x512xf32>
    %c56_i32 = arith.constant 56 : i32
    %39 = tpu.dynamic_rotate %31 by %c56_i32 dim 1 : vector<16x512xf32>, i32 -> vector<16x512xf32>
    %c55_i32 = arith.constant 55 : i32
    %40 = tpu.dynamic_rotate %31 by %c55_i32 dim 1 : vector<16x512xf32>, i32 -> vector<16x512xf32>
    %c9_i32 = arith.constant 9 : i32
    %41 = tpu.dynamic_rotate %31 by %c9_i32 dim 1 : vector<16x512xf32>, i32 -> vector<16x512xf32>
    %c8_i32 = arith.constant 8 : i32
    %42 = tpu.dynamic_rotate %31 by %c8_i32 dim 1 : vector<16x512xf32>, i32 -> vector<16x512xf32>
    %c7_i32 = arith.constant 7 : i32
    %43 = tpu.dynamic_rotate %31 by %c7_i32 dim 1 : vector<16x512xf32>, i32 -> vector<16x512xf32>
    %c1_i32 = arith.constant 1 : i32
    %44 = tpu.dynamic_rotate %31 by %c1_i32 dim 1 : vector<16x512xf32>, i32 -> vector<16x512xf32>
    %c511_i32 = arith.constant 511 : i32
    %45 = tpu.dynamic_rotate %31 by %c511_i32 dim 1 : vector<16x512xf32>, i32 -> vector<16x512xf32>
    %c505_i32 = arith.constant 505 : i32
    %46 = tpu.dynamic_rotate %31 by %c505_i32 dim 1 : vector<16x512xf32>, i32 -> vector<16x512xf32>
    %c504_i32 = arith.constant 504 : i32
    %47 = tpu.dynamic_rotate %31 by %c504_i32 dim 1 : vector<16x512xf32>, i32 -> vector<16x512xf32>
    %c503_i32 = arith.constant 503 : i32
    %48 = tpu.dynamic_rotate %31 by %c503_i32 dim 1 : vector<16x512xf32>, i32 -> vector<16x512xf32>
    %c457_i32 = arith.constant 457 : i32
    %49 = tpu.dynamic_rotate %31 by %c457_i32 dim 1 : vector<16x512xf32>, i32 -> vector<16x512xf32>
    %c456_i32 = arith.constant 456 : i32
    %50 = tpu.dynamic_rotate %31 by %c456_i32 dim 1 : vector<16x512xf32>, i32 -> vector<16x512xf32>
    %c455_i32 = arith.constant 455 : i32
    %51 = tpu.dynamic_rotate %31 by %c455_i32 dim 1 : vector<16x512xf32>, i32 -> vector<16x512xf32>
    %c449_i32 = arith.constant 449 : i32
    %52 = tpu.dynamic_rotate %31 by %c449_i32 dim 1 : vector<16x512xf32>, i32 -> vector<16x512xf32>
    %c448_i32 = arith.constant 448 : i32
    %53 = tpu.dynamic_rotate %31 by %c448_i32 dim 1 : vector<16x512xf32>, i32 -> vector<16x512xf32>
    %c447_i32 = arith.constant 447 : i32
    %54 = tpu.dynamic_rotate %31 by %c447_i32 dim 1 : vector<16x512xf32>, i32 -> vector<16x512xf32>
    %c441_i32 = arith.constant 441 : i32
    %55 = tpu.dynamic_rotate %31 by %c441_i32 dim 1 : vector<16x512xf32>, i32 -> vector<16x512xf32>
    %c440_i32 = arith.constant 440 : i32
    %56 = tpu.dynamic_rotate %31 by %c440_i32 dim 1 : vector<16x512xf32>, i32 -> vector<16x512xf32>
    %c439_i32 = arith.constant 439 : i32
    %57 = tpu.dynamic_rotate %31 by %c439_i32 dim 1 : vector<16x512xf32>, i32 -> vector<16x512xf32>
    %58 = tpu.concatenate %32, %33, %34, %35, %36, %37, %38, %39, %40, %41, %42, %43, %44, %31, %45, %46 in 0 : vector<16x512xf32>, vector<16x512xf32>, vector<16x512xf32>, vector<16x512xf32>, vector<16x512xf32>, vector<16x512xf32>, vector<16x512xf32>, vector<16x512xf32>, vector<16x512xf32>, vector<16x512xf32>, vector<16x512xf32>, vector<16x512xf32>, vector<16x512xf32>, vector<16x512xf32>, vector<16x512xf32>, vector<16x512xf32> -> vector<256x512xf32>
    %59 = tpu.concatenate %47, %48, %49, %50, %51, %52, %53, %54, %55, %56, %57 in 0 : vector<16x512xf32>, vector<16x512xf32>, vector<16x512xf32>, vector<16x512xf32>, vector<16x512xf32>, vector<16x512xf32>, vector<16x512xf32>, vector<16x512xf32>, vector<16x512xf32>, vector<16x512xf32>, vector<16x512xf32> -> vector<176x512xf32>
    %60 = tpu.concatenate %58, %59 in 0 : vector<256x512xf32>, vector<176x512xf32> -> vector<432x512xf32>
    %c0_13 = arith.constant 0 : index
    %c0_14 = arith.constant 0 : index
    %61 = vector.load %arg4[%c0_13, %c0_14] : memref<16x432xf32, #tpu.memory_space<vmem>>, vector<16x432xf32>
    %cst_15 = arith.constant dense<0.000000e+00> : vector<16x512xf32>
    %62 = tpu.matmul %61, %60, %cst_15 {dimension_numbers = #tpu.dot_dimension_numbers<[1], [0], [0], [1], [0, 0, 1, 1], [], []>} : vector<16x432xf32>, vector<432x512xf32>, vector<16x512xf32> -> vector<16x512xf32>
    %63 = vector.broadcast %0 : vector<1x512xf32> to vector<16x512xf32>
    %64 = arith.mulf %62, %63 : vector<16x512xf32>
    %cst_16 = arith.constant dense<0.000000e+00> : vector<16xf32>
    %65 = vector.multi_reduction <add>, %64, %cst_16 [1] : vector<16x512xf32> to vector<16xf32>
    %66 = vector.shape_cast %65 : vector<16xf32> to vector<16x1xf32>
    %cst_17 = arith.constant 0.00462962966 : f32
    %67 = vector.broadcast %cst_17 : f32 to vector<16x1xf32>
    %68 = arith.mulf %66, %67 : vector<16x1xf32>
    %69 = vector.broadcast %68 : vector<16x1xf32> to vector<16x512xf32>
    %70 = arith.subf %62, %69 : vector<16x512xf32>
    %71 = vector.broadcast %0 : vector<1x512xf32> to vector<16x512xf32>
    %72 = arith.mulf %70, %71 : vector<16x512xf32>
    %73 = arith.mulf %72, %72 : vector<16x512xf32>
    %cst_18 = arith.constant dense<0.000000e+00> : vector<16xf32>
    %74 = vector.multi_reduction <add>, %73, %cst_18 [1] : vector<16x512xf32> to vector<16xf32>
    %75 = vector.shape_cast %74 : vector<16xf32> to vector<16x1xf32>
    %cst_19 = arith.constant 0.00462962966 : f32
    %76 = vector.broadcast %cst_19 : f32 to vector<16x1xf32>
    %77 = arith.mulf %75, %76 : vector<16x1xf32>
    %78 = vector.broadcast %68 : vector<16x1xf32> to vector<16x512xf32>
    %79 = arith.subf %62, %78 : vector<16x512xf32>
    %cst_20 = arith.constant 9.99999974E-6 : f32
    %80 = vector.broadcast %cst_20 : f32 to vector<16x1xf32>
    %81 = arith.addf %77, %80 : vector<16x1xf32>
    %82 = math.rsqrt %81 : vector<16x1xf32>
    %83 = vector.broadcast %82 : vector<16x1xf32> to vector<16x512xf32>
    %84 = arith.mulf %79, %83 : vector<16x512xf32>
    %cst_21 = arith.constant 0.000000e+00 : f32
    %85 = vector.broadcast %cst_21 : f32 to vector<16x512xf32>
    %86 = arith.cmpf oge, %84, %85 : vector<16x512xf32>
    %cst_22 = arith.constant 0.00999999977 : f32
    %87 = vector.broadcast %cst_22 : f32 to vector<16x512xf32>
    %88 = arith.mulf %87, %84 : vector<16x512xf32>
    %89 = arith.select %86, %84, %88 : vector<16x512xi1>, vector<16x512xf32>
    %c0_23 = arith.constant 0 : index
    %c0_24 = arith.constant 0 : index
    %90 = vector.load %arg5[%c0_23, %c0_24] : memref<16x16xf32, #tpu.memory_space<vmem>>, vector<16x16xf32>
    %cst_25 = arith.constant dense<0.000000e+00> : vector<16x512xf32>
    %91 = tpu.matmul %90, %89, %cst_25 {dimension_numbers = #tpu.dot_dimension_numbers<[1], [0], [0], [1], [0, 0, 1, 1], [], []>} : vector<16x16xf32>, vector<16x512xf32>, vector<16x512xf32> -> vector<16x512xf32>
    %92 = vector.broadcast %0 : vector<1x512xf32> to vector<16x512xf32>
    %93 = arith.mulf %91, %92 : vector<16x512xf32>
    %cst_26 = arith.constant dense<0.000000e+00> : vector<16xf32>
    %94 = vector.multi_reduction <add>, %93, %cst_26 [1] : vector<16x512xf32> to vector<16xf32>
    %95 = vector.shape_cast %94 : vector<16xf32> to vector<16x1xf32>
    %cst_27 = arith.constant 0.00462962966 : f32
    %96 = vector.broadcast %cst_27 : f32 to vector<16x1xf32>
    %97 = arith.mulf %95, %96 : vector<16x1xf32>
    %98 = vector.broadcast %97 : vector<16x1xf32> to vector<16x512xf32>
    %99 = arith.subf %91, %98 : vector<16x512xf32>
    %100 = vector.broadcast %0 : vector<1x512xf32> to vector<16x512xf32>
    %101 = arith.mulf %99, %100 : vector<16x512xf32>
    %102 = arith.mulf %101, %101 : vector<16x512xf32>
    %cst_28 = arith.constant dense<0.000000e+00> : vector<16xf32>
    %103 = vector.multi_reduction <add>, %102, %cst_28 [1] : vector<16x512xf32> to vector<16xf32>
    %104 = vector.shape_cast %103 : vector<16xf32> to vector<16x1xf32>
    %cst_29 = arith.constant 0.00462962966 : f32
    %105 = vector.broadcast %cst_29 : f32 to vector<16x1xf32>
    %106 = arith.mulf %104, %105 : vector<16x1xf32>
    %107 = vector.broadcast %97 : vector<16x1xf32> to vector<16x512xf32>
    %108 = arith.subf %91, %107 : vector<16x512xf32>
    %cst_30 = arith.constant 9.99999974E-6 : f32
    %109 = vector.broadcast %cst_30 : f32 to vector<16x1xf32>
    %110 = arith.addf %106, %109 : vector<16x1xf32>
    %111 = math.rsqrt %110 : vector<16x1xf32>
    %112 = vector.broadcast %111 : vector<16x1xf32> to vector<16x512xf32>
    %113 = arith.mulf %108, %112 : vector<16x512xf32>
    %114 = arith.addf %113, %2 : vector<16x512xf32>
    %cst_31 = arith.constant 0.000000e+00 : f32
    %115 = vector.broadcast %cst_31 : f32 to vector<16x512xf32>
    %116 = arith.cmpf oge, %114, %115 : vector<16x512xf32>
    %cst_32 = arith.constant 0.00999999977 : f32
    %117 = vector.broadcast %cst_32 : f32 to vector<16x512xf32>
    %118 = arith.mulf %117, %114 : vector<16x512xf32>
    %119 = arith.select %116, %114, %118 : vector<16x512xi1>, vector<16x512xf32>
    %c0_33 = arith.constant 0 : index
    %c0_34 = arith.constant 0 : index
    %c0_35 = arith.constant 0 : index
    %120 = vector.load %arg6[%c0_33, %c0_34, %c0_35] : memref<1x16x512xf32, #tpu.memory_space<vmem>>, vector<1x16x512xf32>
    %121 = vector.shape_cast %120 : vector<1x16x512xf32> to vector<16x512xf32>
    %122 = vector.shape_cast %119 : vector<16x512xf32> to vector<1x16x512xf32>
    tpu.vector_store %arg6[%c0_33, %c0_34, %c0_35], %122 {strides = array<i32>} : memref<1x16x512xf32, #tpu.memory_space<vmem>>, vector<1x16x512xf32>,
    return
  }
  func.func @transform_0(%arg0: i32) -> (i32, i32) {
    %c0_i32 = arith.constant 0 : i32
    %c0_i32_0 = arith.constant 0 : i32
    %c0_i32_1 = arith.constant 0 : i32
    return %c0_i32, %c0_i32_0 : i32, i32
  }
  func.func @transform_1(%arg0: i32) -> (i32, i32, i32) {
    %c0_i32 = arith.constant 0 : i32
    %c0_i32_0 = arith.constant 0 : i32
    %c0_i32_1 = arith.constant 0 : i32
    return %arg0, %c0_i32, %c0_i32_0 : i32, i32, i32
  }
  func.func @transform_2(%arg0: i32) -> (i32, i32) {
    %c0_i32 = arith.constant 0 : i32
    %c0_i32_0 = arith.constant 0 : i32
    %c0_i32_1 = arith.constant 0 : i32
    return %c0_i32, %c0_i32_0 : i32, i32
  }
  func.func @transform_3(%arg0: i32) -> (i32, i32) {
    %c0_i32 = arith.constant 0 : i32
    %c0_i32_0 = arith.constant 0 : i32
    %c0_i32_1 = arith.constant 0 : i32
    return %c0_i32, %c0_i32_0 : i32, i32
  }
  func.func @transform_4(%arg0: i32) -> (i32, i32) {
    %c0_i32 = arith.constant 0 : i32
    %c0_i32_0 = arith.constant 0 : i32
    %c0_i32_1 = arith.constant 0 : i32
    return %c0_i32, %c0_i32_0 : i32, i32
  }
  func.func @transform_5(%arg0: i32) -> (i32, i32, i32) {
    %c0_i32 = arith.constant 0 : i32
    %c0_i32_0 = arith.constant 0 : i32
    %c0_i32_1 = arith.constant 0 : i32
    return %arg0, %c0_i32, %c0_i32_0 : i32, i32, i32
  }
}

</mosaic_0001>

<bundles_post_ra>
// kernel: bottleneck_forward.1
= control target key start
LH: loop header
LB: loop body
LE: loop exit
PB: predicated region body
PF: predicated region fallthrough
CT: control target
= control target key end

     0   :  { %s2381_s18 = smov 0   ;;  %s3124_s0 = inlined_call_operand.vmem [shape: f32[1,512], index: 0, kind: input, shape index: {}]   ;;  %s3125_s1 = inlined_call_operand.vmem [shape: f32[2,16,512], index: 1, kind: input, shape index: {}, may-alias: {1,5}]   ;;  %s3126_s2 = inlined_call_operand.vmem [shape: f32[16,16], index: 2, kind: input, shape index: {}]   ;;  %s3127_s3 = inlined_call_operand.vmem [shape: f32[16,432], index: 3, kind: input, shape index: {}]   ;;  %s3128_s4 = inlined_call_operand.vmem [shape: f32[16,16], index: 4, kind: input, shape index: {}]   ;;  %s3129_s5 = inlined_call_operand.vmem [shape: f32[2,16,512], index: 5, kind: output, shape index: {}, may-alias: {1,5}]  }
   0x1 LB: > { %s1677_s19 = sadd.s32 4294967295, %s2331_s18   ;;  %p1681_p0 = scmp.ge.s32.totalorder %s2331_s18, 1  ;;  %s2331_s18 = sphi %s2381_s18, %s15_s18  }
   0x2   : > { %p187_p1 = scmp.lt.s32.totalorder %s2331_s18, 3 }
   0x4   : > { %p188_p2 = pnand %p1681_p0, %p187_p1 }
   0x6   : > { %191 = sbr.rel (%p188_p2) target bundleno = 1962 (0x7aa), region = 40 }
   0xd   : > { %p215_p3 = scmp.lt.s32.totalorder %s1677_s19, 1  ;;  %v3130_v0 = vmov 0.0   ;;  %v234_v13 = vld [vmem:[%s3126_s2] sm:$0xff]  ;;  %vm236_vm0 = vcmask 130048   ;;  %v235_v14 = vld [vmem:[%s3126_s2 + $0x8] sm:$0xff]  ;;  %v398_v15 = vlaneseq  ;;  %s2334_s30 = smov 73  }
   0xe   : > { %307 = vmatprep.mubr.f32.mxu0 %v3130_v0  ;;  %384 = vmatprep.mubr.f32.mxu1 %v3130_v0  ;;  %v225_v18 = vld [vmem:[%s3124_s0] sm:$0xf]  ;;  %s2335_s6 = smov 72   ;;  %s2336_s7 = smov 71  }
   0xf   : > { %s3175_s19 = smov (!%p215_p3, %s1677_s19), 1  ;;  %v399_v16 = vshrl.u32 %v398_v15, 7  ;;  %s2337_s8 = smov 65  }
  0x10   : > { %s1700_s20 = sshll.u32 %s3175_s19, 6  ;;  %s2338_s9 = smov 64  }
  0x11   : > { %s2399_s23 = scalar_lea.vmem %s3125_s1, %s1700_s20  ;;  %v400_v17 = vsub.s32 0, %v399_v16  ;;  %v404_v19 = vsub.s32 1, %v399_v16  ;;  %v408_v20 = vsub.s32 2, %v399_v16  ;;  %v412_v24 = vsub.s32 3, %v399_v16  ;;  %s2339_s10 = smov 63  }
  0x12   : > { %v227_v1 = vld [vmem:[%s2399_s23 + $0x8] sm:$0xff]  ;;  %v226_v3 = vld [vmem:[%s2399_s23] sm:$0xff]  ;;  %v229_v6 = vld [vmem:[%s2399_s23 + $0x18] sm:$0xff]  ;;  %s2340_s11 = smov 57   ;;  %s2341_s12 = smov 56  }
  0x13   : > { %v2403_v2 = vld [vmem:[%s2399_s23 + $0x28] sm:$0xff]  ;;  %v230_v5 = vld [vmem:[%s2399_s23 + $0x20] sm:$0xff]  ;;  %v2410_v7 = vld [vmem:[%s2399_s23 + $0x38] sm:$0xff]  ;;  %v2434_v21 = vrot.slane %v225_v18, %v400_v17  ;;  %v2436_v22 = vrot.slane %v225_v18, %v404_v19  ;;  %v2438_v23 = vrot.slane %v225_v18, %v408_v20  ;;  %v2443_v32 = vrot.slane %v225_v18, %v412_v24  ;;  %s2342_s13 = smov 55   ;;  %s2343_s14 = smov 9  }
  0x14   : > { %3147 = vst [vmem:[#allocation2_spill] sm:$0xff] %v2403_v2  ;;  %v1702_v4 = vpack.c.bf16 %v2403_v2, %v227_v1  ;;  %3148 = vst [vmem:[#allocation3_spill] sm:$0xff] %v2410_v7  ;;  %v1704_v8 = vpack.c.bf16 %v230_v5, %v226_v3  ;;  %v1706_v9 = vpack.c.bf16 %v2410_v7, %v229_v6  ;;  %v228_v10 = vld [vmem:[%s2399_s23 + $0x10] sm:$0xff]  ;;  %s2344_s15 = smov 8   ;;  %s2345_s16 = smov 7  }
  0x15   : > { %v2415_v11 = vld [vmem:[%s2399_s23 + $0x30] sm:$0xff]  ;;  %3150 = vst [vmem:[#allocation5_spill] sm:$0xff] %v2434_v21  ;;  %3151 = vst [vmem:[#allocation6_spill] sm:$0xff] %v2436_v22  ;;  %s2346_s17 = smov 1   ;;  %s2347_s21 = smov 127  }
  0x16   : > { %3149 = vst [vmem:[#allocation4_spill] sm:$0xff] %v2415_v11  ;;  %1703 = vmatprep.subr.bf16.mxu0 %v1702_v4  ;;  %v1708_v12 = vpack.c.bf16 %v2415_v11, %v228_v10  ;;  %1707 = vmatprep.subr.bf16.mxu1 %v1706_v9  ;;  %3152 = vst [vmem:[#allocation7_spill] sm:$0xff] %v2438_v23  ;;  %s2348_s22 = smov 121   ;;  %s2349_s24 = smov 120  }
  0x17   : > { %1705 = vmatpush1.bf16.msra.mxu0 %v1704_v8  ;;  %3153 = vst [vmem:[#allocation8_spill] sm:$0xff] %v2443_v32  ;;  %s2350_s27 = smov 119  }
  0x18   : > { %1709 = vmatpush1.bf16.msra.mxu1 %v1708_v12 }
  0x1a   : > { %1686 = vmatmul.mubr.msk.f32.vlgmr.msra.gmra.mrb[0].mxu0 %vm236_vm0, %v234_v13 }
  0x1b   : > { %1688 = vmatmul.mubr.msk.f32.vlgmr.msra.gmra.mrb[0].mxu1 %vm236_vm0, %v234_v13  ;;  %313 = vmatprep.mubr.f32.mxu0 %v3130_v0 }
  0x1c   : > { %390 = vmatprep.mubr.f32.mxu1 %v3130_v0 }
  0x1e   : > { %1687 = vmatmul.mubr.msk.f32.gmra.mrb[2].mxu0 %vm236_vm0, %v235_v14 }
  0x1f   : > { %1689 = vmatmul.mubr.msk.f32.gmra.mrb[2].mxu1 %vm236_vm0, %v235_v14 }
  0xed   : > { %v309_v25 = vpop.f32.mrb[0].mxu0 }
  0xee   : > { %v418_v26 = vmul.f32 %v2434_v21, %v309_v25  ;;  %v311_v27 = vpop.f32.mrb[1].mxu0  ;;  %v386_v28 = vpop.f32.mrb[0].mxu1 }
  0xef   : > { %v419_v29 = vmul.f32 %v2436_v22, %v311_v27  ;;  %v420_v30 = vmul.f32 %v2438_v23, %v386_v28  ;;  %v388_v31 = vpop.f32.mrb[1].mxu1 }
  0xf0   : > { %v421_v38 = vmul.f32 %v2443_v32, %v388_v31 }
  0xf1   : > { %v426_v33 = vadd.f32 %v419_v29, %v418_v26  ;;  %v315_v34 = vpop.f32.mrb[2].mxu0 }
  0xf2   : > { %v422_v35 = vmul.f32 %v2434_v21, %v315_v34  ;;  %v317_v36 = vpop.f32.mrb[3].mxu0  ;;  %v392_v37 = vpop.f32.mrb[2].mxu1 }
  0xf3   : > { %v423_v39 = vmul.f32 %v2436_v22, %v317_v36  ;;  %v424_v40 = vmul.f32 %v2438_v23, %v392_v37  ;;  %v394_v41 = vpop.f32.mrb[3].mxu1  ;;  %v427_v42 = vadd.f32 %v426_v33, %v420_v30 }
  0xf4   : > { %v425_v45 = vmul.f32 %v2443_v32, %v394_v41 }
  0xf5   : > { %v431_v43 = vadd.f32 %v423_v39, %v422_v35  ;;  %v428_v44 = vadd.f32 %v427_v42, %v421_v38 }
  0xf7   : > { %429 = vadd.xlane.f32.xlu0 %v428_v44  ;;  %v432_v46 = vadd.f32 %v431_v43, %v424_v40 }
  0xf9   : > { %v433_v47 = vadd.f32 %v432_v46, %v425_v45 }
  0xfb   : > { %434 = vadd.xlane.f32.xlu0 %v433_v47 }
 0x184   : > { %v430_v48 = vpop.xlane.xlu0 %429 }
 0x185   : > { %v436_v49 = vmul.f32 0.0046296297, %v430_v48 }
 0x187   : > { %v438_v50 = vsub.f32 %v309_v25, %v436_v49  ;;  %v439_v51 = vsub.f32 %v311_v27, %v436_v49  ;;  %v440_v52 = vsub.f32 %v386_v28, %v436_v49  ;;  %v441_v53 = vsub.f32 %v388_v31, %v436_v49 }
 0x188   : > { %v435_v54 = vpop.xlane.xlu0 %434 }
 0x189   : > { %v437_v55 = vmul.f32 0.0046296297, %v435_v54  ;;  %v446_v56 = vmul.f32 %v438_v50, %v2434_v21  ;;  %v447_v57 = vmul.f32 %v439_v51, %v2436_v22  ;;  %v448_v58 = vmul.f32 %v440_v52, %v2438_v23 }
 0x18a   : > { %v449_v59 = vmul.f32 %v441_v53, %v2443_v32 }
 0x18b   : > { %v442_v60 = vsub.f32 %v315_v34, %v437_v55  ;;  %v443_v61 = vsub.f32 %v317_v36, %v437_v55  ;;  %v454_v62 = vmul.f32 %v446_v56, %v446_v56  ;;  %v455_v63 = vmul.f32 %v447_v57, %v447_v57 }
 0x18c   : > { %v444_v1 = vsub.f32 %v392_v37, %v437_v55  ;;  %v445_v3 = vsub.f32 %v394_v41, %v437_v55  ;;  %v456_v4 = vmul.f32 %v448_v58, %v448_v58  ;;  %v457_v9 = vmul.f32 %v449_v59, %v449_v59 }
 0x18d   : > { %v462_v5 = vadd.f32 %v455_v63, %v454_v62  ;;  %v450_v6 = vmul.f32 %v442_v60, %v2434_v21  ;;  %v451_v8 = vmul.f32 %v443_v61, %v2436_v22 }
 0x18e   : > { %v452_v10 = vmul.f32 %v444_v1, %v2438_v23  ;;  %v453_v13 = vmul.f32 %v445_v3, %v2443_v32 }
 0x18f   : > { %v463_v12 = vadd.f32 %v462_v5, %v456_v4  ;;  %v458_v14 = vmul.f32 %v450_v6, %v450_v6  ;;  %v459_v16 = vmul.f32 %v451_v8, %v451_v8  ;;  %v2555_v5 = vand.u32 127, %v398_v15 }
 0x190   : > { %v460_v18 = vmul.f32 %v452_v10, %v452_v10  ;;  %v461_v20 = vmul.f32 %v453_v13, %v453_v13 }
 0x191   : > { %v464_v17 = vadd.f32 %v463_v12, %v457_v9  ;;  %v467_v19 = vadd.f32 %v459_v16, %v458_v14  ;;  %vm528_vm9 = vcmp.lt.s32.totalorder %v2555_v5, 73  ;;  %vm553_vm10 = vcmp.lt.s32.totalorder %v2555_v5, 72 }
 0x192   : > { %vm578_vm11 = vcmp.lt.s32.totalorder %v2555_v5, 71  ;;  %vm603_vm12 = vcmp.lt.s32.totalorder %v2555_v5, 65  ;;  %vm628_vm13 = vcmp.lt.s32.totalorder %v2555_v5, 64  ;;  %vm653_vm14 = vcmp.lt.s32.totalorder %v2555_v5, 63 }
 0x193   : > { %465 = vadd.xlane.f32.xlu1 %v464_v17  ;;  %v468_v24 = vadd.f32 %v467_v19, %v460_v18  ;;  %v938_v19 = vld [vmem:[%s3127_s3 + $0x8] sm:$0xff]  ;;  %vm678_vm15 = vcmp.lt.s32.totalorder %v2555_v5, 57 }
 0x194   : > { %1016 = vmatprep.mubr.f32.mxu0 %v938_v19  ;;  %1170 = vmatprep.mubr.f32.mxu1 %v938_v19 }
 0x195   : > { %v469_v25 = vadd.f32 %v468_v24, %v461_v20 }
 0x197   : > { %470 = vadd.xlane.f32.xlu1 %v469_v25 }
 0x220   : > { %v466_v26 = vpop.xlane.xlu1 %465 }
 0x221   : > { %v472_v27 = vmul.f32 0.0046296297, %v466_v26 }
 0x223   : > { %v474_v28 = vadd.f32 1e-05, %v472_v27 }
 0x224   : > { %v471_v29 = vpop.xlane.xlu1 %470 }
 0x225   : > { %2308 = vrsqrt.f32 %v474_v28  ;;  %v473_v30 = vmul.f32 0.0046296297, %v471_v29 }
 0x227   : > { %v475_v31 = vadd.f32 1e-05, %v473_v30 }
 0x229   : > { %2310 = vrsqrt.f32 %v475_v31 }
 0x22f   : > { %v2309_v33 = vpop.eup %2308 }
 0x230   : > { %v478_v34 = vmul.f32 %v2309_v33, %v438_v50  ;;  %v479_v35 = vmul.f32 %v2309_v33, %v439_v51  ;;  %v481_v37 = vmul.f32 %v2309_v33, %v441_v53  ;;  %v480_v46 = vmul.f32 %v2309_v33, %v440_v52 }
 0x232   : > { %v494_v40 = vmul.f32 0.01, %v478_v34  ;;  %v495_v41 = vmul.f32 0.01, %v479_v35  ;;  %vm486_vm1 = vcmp.ge.f32.partialorder %v478_v34, 0.0  ;;  %vm487_vm2 = vcmp.ge.f32.partialorder %v479_v35, 0.0 }
 0x233   : > { %v2311_v36 = vpop.eup %2310  ;;  %v497_v47 = vmul.f32 0.01, %v481_v37  ;;  %vm489_vm6 = vcmp.ge.f32.partialorder %v481_v37, 0.0  ;;  %v496_v57 = vmul.f32 0.01, %v480_v46  ;;  %vm488_vm8 = vcmp.ge.f32.partialorder %v480_v46, 0.0 }
 0x234   : > { %v482_v38 = vmul.f32 %v2311_v36, %v442_v60  ;;  %v483_v39 = vmul.f32 %v2311_v36, %v443_v61  ;;  %v485_v42 = vmul.f32 %v2311_v36, %v445_v3  ;;  %v484_v43 = vmul.f32 %v2311_v36, %v444_v1 }
 0x235   : > { %v2458_v49 = vsel %vm486_vm1, %v478_v34, %v494_v40  ;;  %v2460_v50 = vsel %vm487_vm2, %v479_v35, %v495_v41  ;;  %v2478_v58 = vsel %vm489_vm6, %v481_v37, %v497_v47  ;;  %v2488_v61 = vsel %vm488_vm8, %v480_v46, %v496_v57 }
 0x236   : > { %vm490_vm3 = vcmp.ge.f32.partialorder %v482_v38, 0.0  ;;  %vm491_vm4 = vcmp.ge.f32.partialorder %v483_v39, 0.0  ;;  %v498_v44 = vmul.f32 0.01, %v482_v38  ;;  %v499_v45 = vmul.f32 0.01, %v483_v39 }
 0x237   : > { %vm493_vm5 = vcmp.ge.f32.partialorder %v485_v42, 0.0  ;;  %v501_v48 = vmul.f32 0.01, %v485_v42  ;;  %v500_v52 = vmul.f32 0.01, %v484_v43  ;;  %vm492_vm7 = vcmp.ge.f32.partialorder %v484_v43, 0.0 }
 0x238   : > { %v2462_v51 = vsel %vm490_vm3, %v482_v38, %v498_v44  ;;  %v2464_v53 = vsel %vm491_vm4, %v483_v39, %v499_v45  ;;  %vm703_vm1 = vcmp.lt.s32.totalorder %v2555_v5, 56  ;;  %vm728_vm2 = vcmp.lt.s32.totalorder %v2555_v5, 55 }
 0x239   : > { %v2468_v54 = vpack.i.bf16 %v2464_v53, %v2460_v50  ;;  %v2472_v55 = vpack.i.bf16 %v2462_v51, %v2458_v49  ;;  %v2474_v56 = vsel %vm493_vm5, %v485_v42, %v501_v48  ;;  %v2484_v60 = vsel %vm492_vm7, %v484_v43, %v500_v52 }
 0x23a   : > { %v2482_v59 = vpack.i.bf16 %v2474_v56, %v2478_v58  ;;  %v2492_v62 = vpack.i.bf16 %v2484_v60, %v2488_v61  ;;  %vm753_vm3 = vcmp.lt.s32.totalorder %v2555_v5, 9  ;;  %vm778_vm4 = vcmp.lt.s32.totalorder %v2555_v5, 8 }
 0x23b   : > { %1974 = vrot.lane.b32.xlu1 %v2468_v54, %s2334_s30  ;;  %1969 = vrot.lane.b32.xlu0 %v2472_v55, %s2334_s30  ;;  %vm803_vm5 = vcmp.lt.s32.totalorder %v2555_v5, 7  ;;  %vm828_vm6 = vcmp.lt.s32.totalorder %v2555_v5, 1  ;;  %vm853_vm7 = vcmp.lt.s32.totalorder %v2555_v5, 127  ;;  %vm878_vm8 = vcmp.lt.s32.totalorder %v2555_v5, 121 }
 0x23f   : > { %1979 = vrot.lane.b32.xlu1 %v2482_v59, %s2334_s30  ;;  %1989 = vrot.lane.b32.xlu0 %v2472_v55, %s2335_s6 }
 0x243   : > { %1984 = vrot.lane.b32.xlu1 %v2492_v62, %s2334_s30  ;;  %1999 = vrot.lane.b32.xlu0 %v2482_v59, %s2335_s6 }
 0x247   : > { %1994 = vrot.lane.b32.xlu1 %v2468_v54, %s2335_s6  ;;  %2009 = vrot.lane.b32.xlu0 %v2472_v55, %s2336_s7 }
 0x24b   : > { %2004 = vrot.lane.b32.xlu1 %v2492_v62, %s2335_s6  ;;  %2019 = vrot.lane.b32.xlu0 %v2482_v59, %s2336_s7 }
 0x24f   : > { %2014 = vrot.lane.b32.xlu1 %v2468_v54, %s2336_s7  ;;  %2029 = vrot.lane.b32.xlu0 %v2472_v55, %s2337_s8 }
 0x253   : > { %2024 = vrot.lane.b32.xlu1 %v2492_v62, %s2336_s7  ;;  %2039 = vrot.lane.b32.xlu0 %v2482_v59, %s2337_s8 }
 0x257   : > { %2034 = vrot.lane.b32.xlu1 %v2468_v54, %s2337_s8  ;;  %2049 = vrot.lane.b32.xlu0 %v2472_v55, %s2338_s9 }
 0x25b   : > { %2044 = vrot.lane.b32.xlu1 %v2492_v62, %s2337_s8  ;;  %2059 = vrot.lane.b32.xlu0 %v2482_v59, %s2338_s9 }
 0x25f   : > { %2054 = vrot.lane.b32.xlu1 %v2468_v54, %s2338_s9  ;;  %2069 = vrot.lane.b32.xlu0 %v2472_v55, %s2339_s10 }
 0x263   : > { %2064 = vrot.lane.b32.xlu1 %v2492_v62, %s2338_s9  ;;  %2079 = vrot.lane.b32.xlu0 %v2482_v59, %s2339_s10 }
 0x267   : > { %2074 = vrot.lane.b32.xlu1 %v2468_v54, %s2339_s10  ;;  %2089 = vrot.lane.b32.xlu0 %v2472_v55, %s2340_s11 }
 0x26b   : > { %2084 = vrot.lane.b32.xlu1 %v2492_v62, %s2339_s10  ;;  %2099 = vrot.lane.b32.xlu0 %v2482_v59, %s2340_s11 }
 0x26f   : > { %2094 = vrot.lane.b32.xlu1 %v2468_v54, %s2340_s11  ;;  %2109 = vrot.lane.b32.xlu0 %v2472_v55, %s2341_s12 }
 0x273   : > { %2104 = vrot.lane.b32.xlu1 %v2492_v62, %s2340_s11  ;;  %2119 = vrot.lane.b32.xlu0 %v2482_v59, %s2341_s12 }
 0x277   : > { %2114 = vrot.lane.b32.xlu1 %v2468_v54, %s2341_s12  ;;  %2129 = vrot.lane.b32.xlu0 %v2472_v55, %s2342_s13 }
 0x27b   : > { %2124 = vrot.lane.b32.xlu1 %v2492_v62, %s2341_s12  ;;  %2139 = vrot.lane.b32.xlu0 %v2482_v59, %s2342_s13 }
 0x27f   : > { %2134 = vrot.lane.b32.xlu1 %v2468_v54, %s2342_s13  ;;  %2149 = vrot.lane.b32.xlu0 %v2472_v55, %s2343_s14 }
 0x283   : > { %2144 = vrot.lane.b32.xlu1 %v2492_v62, %s2342_s13  ;;  %2159 = vrot.lane.b32.xlu0 %v2482_v59, %s2343_s14 }
 0x287   : > { %2154 = vrot.lane.b32.xlu1 %v2468_v54, %s2343_s14  ;;  %2169 = vrot.lane.b32.xlu0 %v2472_v55, %s2344_s15 }
 0x28b   : > { %2164 = vrot.lane.b32.xlu1 %v2492_v62, %s2343_s14  ;;  %2179 = vrot.lane.b32.xlu0 %v2482_v59, %s2344_s15 }
 0x28f   : > { %2174 = vrot.lane.b32.xlu1 %v2468_v54, %s2344_s15  ;;  %2189 = vrot.lane.b32.xlu0 %v2472_v55, %s2345_s16 }
 0x293   : > { %2184 = vrot.lane.b32.xlu1 %v2492_v62, %s2344_s15  ;;  %2199 = vrot.lane.b32.xlu0 %v2482_v59, %s2345_s16 }
 0x297   : > { %2194 = vrot.lane.b32.xlu1 %v2468_v54, %s2345_s16  ;;  %2209 = vrot.lane.b32.xlu0 %v2472_v55, %s2346_s17 }
 0x29b   : > { %2204 = vrot.lane.b32.xlu1 %v2492_v62, %s2345_s16  ;;  %2219 = vrot.lane.b32.xlu0 %v2482_v59, %s2346_s17 }
 0x29f   : > { %2214 = vrot.lane.b32.xlu1 %v2468_v54, %s2346_s17  ;;  %2229 = vrot.lane.b32.xlu0 %v2468_v54, %s2347_s21 }
 0x2a3   : > { %2224 = vrot.lane.b32.xlu1 %v2492_v62, %s2346_s17  ;;  %2239 = vrot.lane.b32.xlu0 %v2472_v55, %s2347_s21 }
 0x2a7   : > { %2234 = vrot.lane.b32.xlu1 %v2492_v62, %s2347_s21  ;;  %2249 = vrot.lane.b32.xlu0 %v2468_v54, %s2348_s22 }
 0x2ab   : > { %2244 = vrot.lane.b32.xlu1 %v2482_v59, %s2347_s21  ;;  %2259 = vrot.lane.b32.xlu0 %v2472_v55, %s2348_s22 }
 0x2ad   : > { %v1975_v6 = vpop.permute.xlu1 %1974  ;;  %v1970_v8 = vpop.permute.xlu0 %1969 }
 0x2ae   : > { %v1977_v9 = vunpack.i.h.bf16 %v1975_v6  ;;  %v1976_v10 = vunpack.i.l.bf16 %v1975_v6  ;;  %v1972_v12 = vunpack.i.h.bf16 %v1970_v8  ;;  %v1971_v13 = vunpack.i.l.bf16 %v1970_v8 }
 0x2af   : > { %2254 = vrot.lane.b32.xlu1 %v2492_v62, %s2348_s22  ;;  %2269 = vrot.lane.b32.xlu0 %v2468_v54, %s2349_s24 }
 0x2b0   : > { %v533_v15 = vsel %vm528_vm9, %v1971_v13, %v1976_v10  ;;  %v534_v14 = vsel %vm528_vm9, %v1972_v12, %v1977_v9 }
 0x2b1   : > { %v1980_v16 = vpop.permute.xlu1 %1979  ;;  %v1990_v17 = vpop.permute.xlu0 %1989  ;;  %v2567_v18 = vpack.c.bf16 %v534_v14, %v533_v15 }
 0x2b2   : > { %v1982_v20 = vunpack.i.h.bf16 %v1980_v16  ;;  %v1981_v24 = vunpack.i.l.bf16 %v1980_v16  ;;  %v1992_v37 = vunpack.i.h.bf16 %v1990_v17  ;;  %v1991_v38 = vunpack.i.l.bf16 %v1990_v17 }
 0x2b3   : > { %2264 = vrot.lane.b32.xlu1 %v2482_v59, %s2348_s22  ;;  %2279 = vrot.lane.b32.xlu0 %v2472_v55, %s2349_s24 }
 0x2b4   : > { %v535_v25 = vsel %vm528_vm9, %v1981_v24, %v1971_v13  ;;  %v536_v26 = vsel %vm528_vm9, %v1982_v20, %v1972_v12  ;;  %1711 = vmatprep.subr.bf16.mxu0 %v2567_v18 }
 0x2b5   : > { %v2580_v27 = vpack.c.bf16 %v536_v26, %v535_v25  ;;  %v1985_v28 = vpop.permute.xlu1 %1984  ;;  %v2000_v29 = vpop.permute.xlu0 %1999 }
 0x2b6   : > { %v1987_v30 = vunpack.i.h.bf16 %v1985_v28  ;;  %v1986_v31 = vunpack.i.l.bf16 %v1985_v28  ;;  %v2002_v33 = vunpack.i.h.bf16 %v2000_v29  ;;  %v2001_v34 = vunpack.i.l.bf16 %v2000_v29 }
 0x2b7   : > { %2274 = vrot.lane.b32.xlu1 %v2492_v62, %s2349_s24  ;;  %2289 = vrot.lane.b32.xlu0 %v2468_v54, %s2350_s27 }
 0x2b8   : > { %v531_v35 = vsel %vm528_vm9, %v1976_v10, %v1986_v31  ;;  %v532_v36 = vsel %vm528_vm9, %v1977_v9, %v1987_v30  ;;  %1713 = vmatpush1.bf16.msra.mxu0 %v2580_v27  ;;  %v529_v41 = vsel %vm528_vm9, %v1986_v31, %v1981_v24  ;;  %v530_v42 = vsel %vm528_vm9, %v1987_v30, %v1982_v20 }
 0x2b9   : > { %v1995_v39 = vpop.permute.xlu1 %1994  ;;  %v2010_v40 = vpop.permute.xlu0 %2009  ;;  %v2596_v43 = vpack.c.bf16 %v532_v36, %v531_v35  ;;  %v560_v46 = vsel %vm553_vm10, %v2001_v34, %v1991_v38  ;;  %v561_v47 = vsel %vm553_vm10, %v2002_v33, %v1992_v37  ;;  %v2604_v48 = vpack.c.bf16 %v530_v42, %v529_v41 }
 0x2ba   : > { %v1997_v44 = vunpack.i.h.bf16 %v1995_v39  ;;  %v1996_v45 = vunpack.i.l.bf16 %v1995_v39  ;;  %v2615_v9 = vpack.c.bf16 %v561_v47, %v560_v46  ;;  %v2012_v16 = vunpack.i.h.bf16 %v2010_v40 }
 0x2bb   : > { %2284 = vrot.lane.b32.xlu1 %v2482_v59, %s2349_s24  ;;  %2299 = vrot.lane.b32.xlu0 %v2472_v55, %s2350_s27  ;;  %v2011_v17 = vunpack.i.l.bf16 %v2010_v40  ;;  %vm903_vm9 = vcmp.lt.s32.totalorder %v2555_v5, 120 }
 0x2bc   : > { %v558_v54 = vsel %vm553_vm10, %v1991_v38, %v1996_v45  ;;  %v559_v52 = vsel %vm553_vm10, %v1992_v37, %v1997_v44  ;;  %1819 = vmatprep.subr.bf16.mxu1 %v2604_v48 }
 0x2bd   : > { %v2005_v57 = vpop.permute.xlu1 %2004  ;;  %v2020_v6 = vpop.permute.xlu0 %2019  ;;  %v2613_v8 = vpack.c.bf16 %v559_v52, %v558_v54  ;;  %1821 = vmatpush1.bf16.msra.mxu1 %v2596_v43 }
 0x2be   : > { %v2007_v10 = vunpack.i.h.bf16 %v2005_v57  ;;  %v2006_v12 = vunpack.i.l.bf16 %v2005_v57  ;;  %v2022_v13 = vunpack.i.h.bf16 %v2020_v6  ;;  %v2021_v55 = vunpack.i.l.bf16 %v2020_v6 }
 0x2bf   : > { %2294 = vrot.lane.b32.xlu1 %v2492_v62, %s2350_s27  ;;  %1715 = vmatprep.subr.bf16.mxu0 %v2613_v8 }
 0x2c0   : > { %v556_v15 = vsel %vm553_vm10, %v1996_v45, %v2006_v12  ;;  %v557_v14 = vsel %vm553_vm10, %v1997_v44, %v2007_v10  ;;  %1717 = vmatpush1.bf16.msra.mxu0 %v2615_v9  ;;  %v554_v24 = vsel %vm553_vm10, %v2006_v12, %v2001_v34  ;;  %v555_v62 = vsel %vm553_vm10, %v2007_v10, %v2002_v33 }
 0x2c1   : > { %v2015_v19 = vpop.permute.xlu1 %2014  ;;  %v2030_v20 = vpop.permute.xlu0 %2029  ;;  %v2631_v25 = vpack.c.bf16 %v557_v14, %v556_v15  ;;  %v585_v29 = vsel %vm578_vm11, %v2021_v55, %v2011_v17  ;;  %v586_v30 = vsel %vm578_vm11, %v2022_v13, %v2012_v16  ;;  %v2639_v31 = vpack.c.bf16 %v555_v62, %v554_v24 }
 0x2c2   : > { %v2017_v26 = vunpack.i.h.bf16 %v2015_v19  ;;  %v2016_v28 = vunpack.i.l.bf16 %v2015_v19  ;;  %v2648_v38 = vpack.c.bf16 %v586_v30, %v585_v29  ;;  %v2032_v45 = vunpack.i.h.bf16 %v2030_v20 }
 0x2c3   : > { %2304 = vrot.lane.b32.xlu1 %v2482_v59, %s2350_s27  ;;  %1823 = vmatprep.subr.bf16.mxu1 %v2639_v31  ;;  %v2031_v46 = vunpack.i.l.bf16 %v2030_v20  ;;  %vm945_vm10 = vcmask 392192   ;;  %s3107_s27 = scalar_lea.vmem %s3129_s5, %s1700_s20 }
 0x2c4   : > { %v583_v34 = vsel %vm578_vm11, %v2011_v17, %v2016_v28  ;;  %v584_v33 = vsel %vm578_vm11, %v2012_v16, %v2017_v26  ;;  %1825 = vmatpush1.bf16.msra.mxu1 %v2631_v25 }
 0x2c5   : > { %v2025_v35 = vpop.permute.xlu1 %2024  ;;  %v2040_v36 = vpop.permute.xlu0 %2039  ;;  %v2646_v37 = vpack.c.bf16 %v584_v33, %v583_v34 }
 0x2c6   : > { %v2027_v39 = vunpack.i.h.bf16 %v2025_v35  ;;  %v2026_v59 = vunpack.i.l.bf16 %v2025_v35  ;;  %v2042_v40 = vunpack.i.h.bf16 %v2040_v36  ;;  %v2041_v41 = vunpack.i.l.bf16 %v2040_v36 }
 0x2c7   : > { %1719 = vmatprep.subr.bf16.mxu0 %v2646_v37 }
 0x2c8   : > { %v581_v42 = vsel %vm578_vm11, %v2016_v28, %v2026_v59  ;;  %v582_v44 = vsel %vm578_vm11, %v2017_v26, %v2027_v39  ;;  %1721 = vmatpush1.bf16.msra.mxu0 %v2648_v38  ;;  %v579_v52 = vsel %vm578_vm11, %v2026_v59, %v2021_v55  ;;  %v580_v57 = vsel %vm578_vm11, %v2027_v39, %v2022_v13 }
 0x2c9   : > { %v2035_v47 = vpop.permute.xlu1 %2034  ;;  %v2050_v54 = vpop.permute.xlu0 %2049  ;;  %v2662_v6 = vpack.c.bf16 %v582_v44, %v581_v42  ;;  %v610_v15 = vsel %vm603_vm12, %v2041_v41, %v2031_v46  ;;  %v611_v14 = vsel %vm603_vm12, %v2042_v40, %v2032_v45  ;;  %v2668_v16 = vpack.c.bf16 %v580_v57, %v579_v52 }
 0x2ca   : > { %v2037_v10 = vunpack.i.h.bf16 %v2035_v47  ;;  %v2036_v12 = vunpack.i.l.bf16 %v2035_v47  ;;  %v2677_v24 = vpack.c.bf16 %v611_v14, %v610_v15  ;;  %v2052_v33 = vunpack.i.h.bf16 %v2050_v54 }
 0x2cb   : > { %1827 = vmatprep.subr.bf16.mxu1 %v2668_v16  ;;  %v2051_v35 = vunpack.i.l.bf16 %v2050_v54  ;;  %vm928_vm11 = vcmp.lt.s32.totalorder %v2555_v5, 119 }
 0x2cc   : > { %v608_v17 = vsel %vm603_vm12, %v2031_v46, %v2036_v12  ;;  %v609_v55 = vsel %vm603_vm12, %v2032_v45, %v2037_v10  ;;  %1829 = vmatpush1.bf16.msra.mxu1 %v2662_v6 }
 0x2cd   : > { %v2045_v13 = vpop.permute.xlu1 %2044  ;;  %v2060_v19 = vpop.permute.xlu0 %2059  ;;  %v2675_v20 = vpack.c.bf16 %v609_v55, %v608_v17 }
 0x2ce   : > { %v2047_v62 = vunpack.i.h.bf16 %v2045_v13  ;;  %v2046_v26 = vunpack.i.l.bf16 %v2045_v13  ;;  %v2062_v28 = vunpack.i.h.bf16 %v2060_v19  ;;  %v2061_v29 = vunpack.i.l.bf16 %v2060_v19 }
 0x2cf   : > { %1723 = vmatprep.subr.bf16.mxu0 %v2675_v20 }
 0x2d0   : > { %v606_v30 = vsel %vm603_vm12, %v2036_v12, %v2046_v26  ;;  %v607_v34 = vsel %vm603_vm12, %v2037_v10, %v2047_v62  ;;  %1725 = vmatpush1.bf16.msra.mxu0 %v2677_v24  ;;  %v604_v59 = vsel %vm603_vm12, %v2046_v26, %v2041_v41  ;;  %v605_v42 = vsel %vm603_vm12, %v2047_v62, %v2042_v40 }
 0x2d1   : > { %v2055_v36 = vpop.permute.xlu1 %2054  ;;  %v2070_v39 = vpop.permute.xlu0 %2069  ;;  %v2691_v44 = vpack.c.bf16 %v607_v34, %v606_v30  ;;  %v635_v47 = vsel %vm628_vm13, %v2061_v29, %v2051_v35  ;;  %v636_v52 = vsel %vm628_vm13, %v2062_v28, %v2052_v33  ;;  %v2697_v57 = vpack.c.bf16 %v605_v42, %v604_v59 }
 0x2d2   : > { %v2057_v45 = vunpack.i.h.bf16 %v2055_v36  ;;  %v2056_v46 = vunpack.i.l.bf16 %v2055_v36  ;;  %v2706_v15 = vpack.c.bf16 %v636_v52, %v635_v47  ;;  %v2072_v26 = vunpack.i.h.bf16 %v2070_v39 }
 0x2d3   : > { %1831 = vmatprep.subr.bf16.mxu1 %v2697_v57  ;;  %v2071_v30 = vunpack.i.l.bf16 %v2070_v39 }
 0x2d4   : > { %v633_v54 = vsel %vm628_vm13, %v2051_v35, %v2056_v46  ;;  %v634_v41 = vsel %vm628_vm13, %v2052_v33, %v2057_v45  ;;  %1833 = vmatpush1.bf16.msra.mxu1 %v2691_v44 }
 0x2d5   : > { %v2065_v40 = vpop.permute.xlu1 %2064  ;;  %v2080_v10 = vpop.permute.xlu0 %2079  ;;  %v2704_v12 = vpack.c.bf16 %v634_v41, %v633_v54 }
 0x2d6   : > { %v2067_v14 = vunpack.i.h.bf16 %v2065_v40  ;;  %v2066_v17 = vunpack.i.l.bf16 %v2065_v40  ;;  %v2082_v55 = vunpack.i.h.bf16 %v2080_v10  ;;  %v2081_v13 = vunpack.i.l.bf16 %v2080_v10 }
 0x2d7   : > { %1727 = vmatprep.subr.bf16.mxu0 %v2704_v12 }
 0x2d8   : > { %v631_v19 = vsel %vm628_vm13, %v2056_v46, %v2066_v17  ;;  %v632_v62 = vsel %vm628_vm13, %v2057_v45, %v2067_v14  ;;  %1729 = vmatpush1.bf16.msra.mxu0 %v2706_v15  ;;  %v629_v35 = vsel %vm628_vm13, %v2066_v17, %v2061_v29  ;;  %v630_v36 = vsel %vm628_vm13, %v2067_v14, %v2062_v28 }
 0x2d9   : > { %v2075_v34 = vpop.permute.xlu1 %2074  ;;  %v2090_v33 = vpop.permute.xlu0 %2089  ;;  %v2720_v59 = vpack.c.bf16 %v632_v62, %v631_v19  ;;  %v660_v45 = vsel %vm653_vm14, %v2081_v13, %v2071_v30  ;;  %v661_v47 = vsel %vm653_vm14, %v2082_v55, %v2072_v26  ;;  %v2726_v52 = vpack.c.bf16 %v630_v36, %v629_v35 }
 0x2da   : > { %v2077_v42 = vunpack.i.h.bf16 %v2075_v34  ;;  %v2076_v46 = vunpack.i.l.bf16 %v2075_v34  ;;  %v2735_v40 = vpack.c.bf16 %v661_v47, %v660_v45  ;;  %v2091_v34 = vunpack.i.l.bf16 %v2090_v33 }
 0x2db   : > { %1835 = vmatprep.subr.bf16.mxu1 %v2726_v52 }
 0x2dc   : > { %v658_v39 = vsel %vm653_vm14, %v2071_v30, %v2076_v46  ;;  %v659_v29 = vsel %vm653_vm14, %v2072_v26, %v2077_v42  ;;  %1837 = vmatpush1.bf16.msra.mxu1 %v2720_v59  ;;  %v2092_v30 = vunpack.i.h.bf16 %v2090_v33 }
 0x2dd   : > { %v2085_v28 = vpop.permute.xlu1 %2084  ;;  %v2100_v54 = vpop.permute.xlu0 %2099  ;;  %v2733_v41 = vpack.c.bf16 %v659_v29, %v658_v39 }
 0x2de   : > { %v2087_v10 = vunpack.i.h.bf16 %v2085_v28  ;;  %v2086_v14 = vunpack.i.l.bf16 %v2085_v28  ;;  %v2102_v17 = vunpack.i.h.bf16 %v2100_v54  ;;  %v2101_v19 = vunpack.i.l.bf16 %v2100_v54 }
 0x2df   : > { %1731 = vmatprep.subr.bf16.mxu0 %v2733_v41 }
 0x2e0   : > { %v656_v62 = vsel %vm653_vm14, %v2076_v46, %v2086_v14  ;;  %v657_v26 = vsel %vm653_vm14, %v2077_v42, %v2087_v10  ;;  %1733 = vmatpush1.bf16.msra.mxu0 %v2735_v40  ;;  %v654_v45 = vsel %vm653_vm14, %v2086_v14, %v2081_v13  ;;  %v655_v47 = vsel %vm653_vm14, %v2087_v10, %v2082_v55 }
 0x2e1   : > { %v2095_v35 = vpop.permute.xlu1 %2094  ;;  %v2110_v36 = vpop.permute.xlu0 %2109  ;;  %v2749_v39 = vpack.c.bf16 %v657_v26, %v656_v62  ;;  %v685_v42 = vsel %vm678_vm15, %v2101_v19, %v2091_v34  ;;  %v686_v28 = vsel %vm678_vm15, %v2102_v17, %v2092_v30  ;;  %v2755_v54 = vpack.c.bf16 %v655_v47, %v654_v45 }
 0x2e2   : > { %v2097_v46 = vunpack.i.h.bf16 %v2095_v35  ;;  %v2096_v29 = vunpack.i.l.bf16 %v2095_v35  ;;  %v2764_v62 = vpack.c.bf16 %v686_v28, %v685_v42  ;;  %v2112_v42 = vunpack.i.h.bf16 %v2110_v36 }
 0x2e3   : > { %1839 = vmatprep.subr.bf16.mxu1 %v2755_v54  ;;  %v2111_v28 = vunpack.i.l.bf16 %v2110_v36 }
 0x2e4   : > { %v683_v33 = vsel %vm678_vm15, %v2091_v34, %v2096_v29  ;;  %v684_v13 = vsel %vm678_vm15, %v2092_v30, %v2097_v46  ;;  %1841 = vmatpush1.bf16.msra.mxu1 %v2749_v39 }
 0x2e5   : > { %v2105_v55 = vpop.permute.xlu1 %2104  ;;  %v2120_v10 = vpop.permute.xlu0 %2119  ;;  %v2762_v14 = vpack.c.bf16 %v684_v13, %v683_v33 }
 0x2e6   : > { %v2107_v26 = vunpack.i.h.bf16 %v2105_v55  ;;  %v2106_v35 = vunpack.i.l.bf16 %v2105_v55  ;;  %v2122_v45 = vunpack.i.h.bf16 %v2120_v10  ;;  %v2121_v47 = vunpack.i.l.bf16 %v2120_v10 }
 0x2e7   : > { %1735 = vmatprep.subr.bf16.mxu0 %v2762_v14 }
 0x2e8   : > { %v681_v34 = vsel %vm678_vm15, %v2096_v29, %v2106_v35  ;;  %v682_v30 = vsel %vm678_vm15, %v2097_v46, %v2107_v26  ;;  %1737 = vmatpush1.bf16.msra.mxu0 %v2764_v62  ;;  %v679_v55 = vsel %vm678_vm15, %v2106_v35, %v2101_v19  ;;  %v680_v10 = vsel %vm678_vm15, %v2107_v26, %v2102_v17 }
 0x2e9   : > { %v2115_v33 = vpop.permute.xlu1 %2114  ;;  %v2130_v13 = vpop.permute.xlu0 %2129  ;;  %v2778_v0 = vpack.c.bf16 %v682_v30, %v681_v34  ;;  %v710_v46 = vsel %vm703_vm1, %v2121_v47, %v2111_v28  ;;  %v711_v3 = vsel %vm703_vm1, %v2122_v45, %v2112_v42  ;;  %v2784_v1 = vpack.c.bf16 %v680_v10, %v679_v55 }
 0x2ea   : > { %v2117_v29 = vunpack.i.h.bf16 %v2115_v33  ;;  %v2116_v4 = vunpack.i.l.bf16 %v2115_v33  ;;  %v2793_v34 = vpack.c.bf16 %v711_v3, %v710_v46  ;;  %v2132_v3 = vunpack.i.h.bf16 %v2130_v13 }
 0x2eb   : > { %1843 = vmatprep.subr.bf16.mxu1 %v2784_v1  ;;  %v2131_v46 = vunpack.i.l.bf16 %v2130_v13 }
 0x2ec   : > { %v708_v36 = vsel %vm703_vm1, %v2111_v28, %v2116_v4  ;;  %v709_v19 = vsel %vm703_vm1, %v2112_v42, %v2117_v29  ;;  %1845 = vmatpush1.bf16.msra.mxu1 %v2778_v0 }
 0x2ed   : > { %v2125_v17 = vpop.permute.xlu1 %2124  ;;  %v2140_v26 = vpop.permute.xlu0 %2139  ;;  %v2791_v35 = vpack.c.bf16 %v709_v19, %v708_v36 }
 0x2ee   : > { %v2127_v30 = vunpack.i.h.bf16 %v2125_v17  ;;  %v2126_v33 = vunpack.i.l.bf16 %v2125_v17  ;;  %v2142_v55 = vunpack.i.h.bf16 %v2140_v26  ;;  %v2141_v10 = vunpack.i.l.bf16 %v2140_v26 }
 0x2ef   : > { %1739 = vmatprep.subr.bf16.mxu0 %v2791_v35 }
 0x2f0   : > { %v706_v28 = vsel %vm703_vm1, %v2116_v4, %v2126_v33  ;;  %v707_v42 = vsel %vm703_vm1, %v2117_v29, %v2127_v30  ;;  %1741 = vmatpush1.bf16.msra.mxu0 %v2793_v34  ;;  %v704_v17 = vsel %vm703_vm1, %v2126_v33, %v2121_v47  ;;  %v705_v26 = vsel %vm703_vm1, %v2127_v30, %v2122_v45 }
 0x2f1   : > { %v2135_v36 = vpop.permute.xlu1 %2134  ;;  %v2150_v19 = vpop.permute.xlu0 %2149  ;;  %v2807_v63 = vpack.c.bf16 %v707_v42, %v706_v28  ;;  %v735_v29 = vsel %vm728_vm2, %v2141_v10, %v2131_v46  ;;  %v736_v11 = vsel %vm728_vm2, %v2142_v55, %v2132_v3  ;;  %v2813_v2 = vpack.c.bf16 %v705_v26, %v704_v17 }
 0x2f2   : > { %v2137_v4 = vunpack.i.h.bf16 %v2135_v36  ;;  %v2136_v7 = vunpack.i.l.bf16 %v2135_v36  ;;  %v2822_v28 = vpack.c.bf16 %v736_v11, %v735_v29  ;;  %v2152_v11 = vunpack.i.h.bf16 %v2150_v19 }
 0x2f3   : > { %3154 = vst [vmem:[#allocation9_spill] sm:$0xff] %v2813_v2  ;;  %1847 = vmatprep.subr.bf16.mxu1 %v2813_v2  ;;  %v2151_v29 = vunpack.i.l.bf16 %v2150_v19 }
 0x2f4   : > { %v733_v13 = vsel %vm728_vm2, %v2131_v46, %v2136_v7  ;;  %v734_v47 = vsel %vm728_vm2, %v2132_v3, %v2137_v4  ;;  %3156 = vst [vmem:[#allocation11_spill] sm:$0xff] %v2822_v28  ;;  %1849 = vmatpush1.bf16.msra.mxu1 %v2807_v63 }
 0x2f5   : > { %v2145_v45 = vpop.permute.xlu1 %2144  ;;  %v2160_v30 = vpop.permute.xlu0 %2159  ;;  %v2820_v33 = vpack.c.bf16 %v734_v47, %v733_v13 }
 0x2f6   : > { %v2147_v42 = vunpack.i.h.bf16 %v2145_v45  ;;  %v2146_v36 = vunpack.i.l.bf16 %v2145_v45  ;;  %v2162_v17 = vunpack.i.h.bf16 %v2160_v30  ;;  %v2161_v26 = vunpack.i.l.bf16 %v2160_v30 }
 0x2f7   : > { %3155 = vst [vmem:[#allocation10_spill] sm:$0xff] %v2820_v33  ;;  %1743 = vmatprep.subr.bf16.mxu0 %v2820_v33 }
 0x2f8   : > { %v731_v46 = vsel %vm728_vm2, %v2136_v7, %v2146_v36  ;;  %v732_v3 = vsel %vm728_vm2, %v2137_v4, %v2147_v42  ;;  %1745 = vmatpush1.bf16.msra.mxu0 %v2822_v28  ;;  %v729_v45 = vsel %vm728_vm2, %v2146_v36, %v2141_v10  ;;  %v730_v30 = vsel %vm728_vm2, %v2147_v42, %v2142_v55 }
 0x2f9   : > { %v2155_v13 = vpop.permute.xlu1 %2154  ;;  %v2170_v47 = vpop.permute.xlu0 %2169  ;;  %v2836_v32 = vpack.c.bf16 %v732_v3, %v731_v46  ;;  %v760_v4 = vsel %vm753_vm3, %v2161_v26, %v2151_v29  ;;  %v761_v22 = vsel %vm753_vm3, %v2162_v17, %v2152_v11  ;;  %v2842_v21 = vpack.c.bf16 %v730_v30, %v729_v45 }
 0x2fa   : > { %v2157_v7 = vunpack.i.h.bf16 %v2155_v13  ;;  %v2156_v23 = vunpack.i.l.bf16 %v2155_v13  ;;  %v1748_v46 = vpack.c.bf16 %v761_v22, %v760_v4  ;;  %v2171_v30 = vunpack.i.l.bf16 %v2170_v47 }
 0x2fb   : > { %3157 = vst [vmem:[#allocation12_spill] sm:$0xff] %v2842_v21  ;;  %1851 = vmatprep.subr.bf16.mxu1 %v2842_v21 }
 0x2fc   : > { %v758_v19 = vsel %vm753_vm3, %v2151_v29, %v2156_v23  ;;  %v759_v10 = vsel %vm753_vm3, %v2152_v11, %v2157_v7  ;;  %1853 = vmatpush1.bf16.msra.mxu1 %v2836_v32  ;;  %v2172_v11 = vunpack.i.h.bf16 %v2170_v47 }
 0x2fd   : > { %v2165_v55 = vpop.permute.xlu1 %2164  ;;  %v2180_v42 = vpop.permute.xlu0 %2179  ;;  %v1746_v36 = vpack.c.bf16 %v759_v10, %v758_v19 }
 0x2fe   : > { %v2167_v3 = vunpack.i.h.bf16 %v2165_v55  ;;  %v2166_v13 = vunpack.i.l.bf16 %v2165_v55  ;;  %v2182_v28 = vunpack.i.h.bf16 %v2180_v42  ;;  %v2181_v2 = vunpack.i.l.bf16 %v2180_v42  ;;  %v3162_v5 = vld [vmem:[#allocation10_spill] sm:$0xff] }
 0x2ff   : > { %1747 = vmatprep.subr.bf16.mxu0 %v1746_v36 }
 0x300   : > { %v756_v45 = vsel %vm753_vm3, %v2156_v23, %v2166_v13  ;;  %v757_v29 = vsel %vm753_vm3, %v2157_v7, %v2167_v3  ;;  %1749 = vmatpush1.bf16.msra.mxu0 %v1748_v46  ;;  %v754_v4 = vsel %vm753_vm3, %v2166_v13, %v2161_v26  ;;  %v755_v10 = vsel %vm753_vm3, %v2167_v3, %v2162_v17 }
 0x301   : > { %v2175_v19 = vpop.permute.xlu1 %2174  ;;  %v2190_v22 = vpop.permute.xlu0 %2189  ;;  %v1856_v55 = vpack.c.bf16 %v757_v29, %v756_v45  ;;  %v785_v23 = vsel %vm778_vm4, %v2181_v2, %v2171_v30  ;;  %v786_v7 = vsel %vm778_vm4, %v2182_v28, %v2172_v11  ;;  %v1854_v46 = vpack.c.bf16 %v755_v10, %v754_v4 }
 0x302   : > { %v2177_v42 = vunpack.i.h.bf16 %v2175_v19  ;;  %v2176_v36 = vunpack.i.l.bf16 %v2175_v19  ;;  %v1752_v3 = vpack.c.bf16 %v786_v7, %v785_v23  ;;  %v2191_v10 = vunpack.i.l.bf16 %v2190_v22 }
 0x303   : > { %1855 = vmatprep.subr.bf16.mxu1 %v1854_v46 }
 0x304   : > { %v783_v47 = vsel %vm778_vm4, %v2171_v30, %v2176_v36  ;;  %v784_v21 = vsel %vm778_vm4, %v2172_v11, %v2177_v42  ;;  %1857 = vmatpush1.bf16.msra.mxu1 %v1856_v55  ;;  %v2192_v11 = vunpack.i.h.bf16 %v2190_v22 }
 0x305   : > { %v2185_v26 = vpop.permute.xlu1 %2184  ;;  %v2200_v13 = vpop.permute.xlu0 %2199  ;;  %v1750_v17 = vpack.c.bf16 %v784_v21, %v783_v47 }
 0x306   : > { %v2187_v45 = vunpack.i.h.bf16 %v2185_v26  ;;  %v2186_v29 = vunpack.i.l.bf16 %v2185_v26  ;;  %v2202_v19 = vunpack.i.h.bf16 %v2200_v13  ;;  %v2201_v33 = vunpack.i.l.bf16 %v2200_v13 }
 0x307   : > { %1751 = vmatprep.subr.bf16.mxu0 %v1750_v17 }
 0x308   : > { %v781_v4 = vsel %vm778_vm4, %v2176_v36, %v2186_v29  ;;  %v782_v30 = vsel %vm778_vm4, %v2177_v42, %v2187_v45  ;;  %1753 = vmatpush1.bf16.msra.mxu0 %v1752_v3  ;;  %v779_v55 = vsel %vm778_vm4, %v2186_v29, %v2181_v2  ;;  %v780_v23 = vsel %vm778_vm4, %v2187_v45, %v2182_v28 }
 0x309   : > { %v2195_v46 = vpop.permute.xlu1 %2194  ;;  %v2210_v21 = vpop.permute.xlu0 %2209  ;;  %v1860_v7 = vpack.c.bf16 %v782_v30, %v781_v4  ;;  %v810_v36 = vsel %vm803_vm5, %v2201_v33, %v2191_v10  ;;  %v811_v42 = vsel %vm803_vm5, %v2202_v19, %v2192_v11  ;;  %v1858_v13 = vpack.c.bf16 %v780_v23, %v779_v55 }
 0x30a   : > { %v2197_v47 = vunpack.i.h.bf16 %v2195_v46  ;;  %v2196_v26 = vunpack.i.l.bf16 %v2195_v46  ;;  %v1756_v45 = vpack.c.bf16 %v811_v42, %v810_v36  ;;  %v2211_v23 = vunpack.i.l.bf16 %v2210_v21 }
 0x30b   : > { %1859 = vmatprep.subr.bf16.mxu1 %v1858_v13 }
 0x30c   : > { %v808_v22 = vsel %vm803_vm5, %v2191_v10, %v2196_v26  ;;  %v809_v17 = vsel %vm803_vm5, %v2192_v11, %v2197_v47  ;;  %1861 = vmatpush1.bf16.msra.mxu1 %v1860_v7  ;;  %v2212_v11 = vunpack.i.h.bf16 %v2210_v21 }
 0x30d   : > { %v2205_v2 = vpop.permute.xlu1 %2204  ;;  %v2220_v3 = vpop.permute.xlu0 %2219  ;;  %v1754_v28 = vpack.c.bf16 %v809_v17, %v808_v22 }
 0x30e   : > { %v2207_v29 = vunpack.i.h.bf16 %v2205_v2  ;;  %v2206_v4 = vunpack.i.l.bf16 %v2205_v2  ;;  %v2222_v30 = vunpack.i.h.bf16 %v2220_v3  ;;  %v2221_v46 = vunpack.i.l.bf16 %v2220_v3 }
 0x30f   : > { %1755 = vmatprep.subr.bf16.mxu0 %v1754_v28 }
 0x310   : > { %v806_v55 = vsel %vm803_vm5, %v2196_v26, %v2206_v4  ;;  %v807_v10 = vsel %vm803_vm5, %v2197_v47, %v2207_v29  ;;  %1757 = vmatpush1.bf16.msra.mxu0 %v1756_v45  ;;  %v804_v7 = vsel %vm803_vm5, %v2206_v4, %v2201_v33  ;;  %v805_v36 = vsel %vm803_vm5, %v2207_v29, %v2202_v19 }
 0x311   : > { %v2215_v13 = vpop.permute.xlu1 %2214  ;;  %v2230_v22 = vpop.permute.xlu0 %2229  ;;  %v1864_v42 = vpack.c.bf16 %v807_v10, %v806_v55  ;;  %v835_v26 = vsel %vm828_vm6, %v2221_v46, %v2211_v23  ;;  %v836_v47 = vsel %vm828_vm6, %v2222_v30, %v2212_v11  ;;  %v1862_v3 = vpack.c.bf16 %v805_v36, %v804_v7 }
 0x312   : > { %v2217_v17 = vunpack.i.h.bf16 %v2215_v13  ;;  %v2216_v2 = vunpack.i.l.bf16 %v2215_v13  ;;  %v1760_v29 = vpack.c.bf16 %v836_v47, %v835_v26  ;;  %v2231_v36 = vunpack.i.l.bf16 %v2230_v22 }
 0x313   : > { %1863 = vmatprep.subr.bf16.mxu1 %v1862_v3 }
 0x314   : > { %v833_v21 = vsel %vm828_vm6, %v2211_v23, %v2216_v2  ;;  %v834_v28 = vsel %vm828_vm6, %v2212_v11, %v2217_v17  ;;  %1865 = vmatpush1.bf16.msra.mxu1 %v1864_v42  ;;  %v2232_v11 = vunpack.i.h.bf16 %v2230_v22  ;;  %v3158_v42 = vpack.c.bf16 %v2464_v53, %v2460_v50 }
 0x315   : > { %v2225_v33 = vpop.permute.xlu1 %2224  ;;  %v2240_v45 = vpop.permute.xlu0 %2239  ;;  %v1758_v19 = vpack.c.bf16 %v834_v28, %v833_v21  ;;  %v3159_v50 = vpack.c.bf16 %v2462_v51, %v2458_v49  ;;  %v3160_v49 = vpack.c.bf16 %v2474_v56, %v2478_v58 }
 0x316   : > { %v2227_v4 = vunpack.i.h.bf16 %v2225_v33  ;;  %v2226_v55 = vunpack.i.l.bf16 %v2225_v33  ;;  %v2242_v10 = vunpack.i.h.bf16 %v2240_v45  ;;  %v2241_v13 = vunpack.i.l.bf16 %v2240_v45 }
 0x317   : > { %1759 = vmatprep.subr.bf16.mxu0 %v1758_v19 }
 0x318   : > { %v831_v7 = vsel %vm828_vm6, %v2216_v2, %v2226_v55  ;;  %v832_v23 = vsel %vm828_vm6, %v2217_v17, %v2227_v4  ;;  %1761 = vmatpush1.bf16.msra.mxu0 %v1760_v29  ;;  %v829_v26 = vsel %vm828_vm6, %v2226_v55, %v2221_v46  ;;  %v830_v2 = vsel %vm828_vm6, %v2227_v4, %v2222_v30 }
 0x319   : > { %v2235_v3 = vpop.permute.xlu1 %2234  ;;  %v2250_v21 = vpop.permute.xlu0 %2249  ;;  %1763 = vmatprep.subr.bf16.mxu0 %v3158_v42  ;;  %v1868_v47 = vpack.c.bf16 %v832_v23, %v831_v7  ;;  %v858_v33 = vsel %vm853_vm7, %v2241_v13, %v2231_v36  ;;  %v859_v22 = vsel %vm853_vm7, %v2242_v10, %v2232_v11  ;;  %v1866_v45 = vpack.c.bf16 %v830_v2, %v829_v26 }
 0x31a   : > { %v2237_v28 = vunpack.i.h.bf16 %v2235_v3  ;;  %v2236_v17 = vunpack.i.l.bf16 %v2235_v3  ;;  %v1768_v4 = vpack.c.bf16 %v859_v22, %v858_v33  ;;  %v2251_v42 = vunpack.i.l.bf16 %v2250_v21 }
 0x31b   : > { %1867 = vmatprep.subr.bf16.mxu1 %v1866_v45 }
 0x31c   : > { %1765 = vmatpush1.bf16.msra.mxu0 %v3159_v50  ;;  %v856_v53 = vsel %vm853_vm7, %v2231_v36, %v2236_v17  ;;  %v857_v30 = vsel %vm853_vm7, %v2232_v11, %v2237_v28  ;;  %1869 = vmatpush1.bf16.msra.mxu1 %v1868_v47  ;;  %v2252_v36 = vunpack.i.h.bf16 %v2250_v21 }
 0x31d   : > { %v2245_v46 = vpop.permute.xlu1 %2244  ;;  %v2260_v19 = vpop.permute.xlu0 %2259  ;;  %v1766_v29 = vpack.c.bf16 %v857_v30, %v856_v53  ;;  %1871 = vmatprep.subr.bf16.mxu1 %v3160_v49 }
 0x31e   : > { %v2247_v55 = vunpack.i.h.bf16 %v2245_v46  ;;  %v2246_v7 = vunpack.i.l.bf16 %v2245_v46  ;;  %v2262_v23 = vunpack.i.h.bf16 %v2260_v19  ;;  %v2261_v3 = vunpack.i.l.bf16 %v2260_v19 }
 0x31f   : > { %1767 = vmatprep.subr.bf16.mxu0 %v1766_v29 }
 0x320   : > { %v854_v51 = vsel %vm853_vm7, %v2236_v17, %v2246_v7  ;;  %v855_v11 = vsel %vm853_vm7, %v2237_v28, %v2247_v55  ;;  %1769 = vmatpush1.bf16.msra.mxu0 %v1768_v4  ;;  %v860_v47 = vsel %vm853_vm7, %v2246_v7, %v2241_v13  ;;  %v861_v56 = vsel %vm853_vm7, %v2247_v55, %v2242_v10  ;;  %v937_v7 = vld [vmem:[%s3127_s3] sm:$0xff] }
 0x321   : > { %v2255_v26 = vpop.permute.xlu1 %2254  ;;  %v2270_v2 = vpop.permute.xlu0 %2269  ;;  %v1876_v58 = vpack.c.bf16 %v855_v11, %v854_v51  ;;  %v3161_v17 = vpack.c.bf16 %v2484_v60, %v2488_v61  ;;  %v883_v22 = vsel %vm878_vm8, %v2261_v3, %v2251_v42  ;;  %v884_v21 = vsel %vm878_vm8, %v2262_v23, %v2252_v36 }
 0x322   : > { %v2257_v33 = vunpack.i.h.bf16 %v2255_v26  ;;  %v2256_v28 = vunpack.i.l.bf16 %v2255_v26  ;;  %v1874_v45 = vpack.c.bf16 %v861_v56, %v860_v47  ;;  %v1772_v61 = vpack.c.bf16 %v884_v21, %v883_v22  ;;  %v942_v47 = vld [vmem:[%s3127_s3 + $0x28] sm:$0xff]  ;;  %v941_v22 = vld [vmem:[%s3127_s3 + $0x20] sm:$0xff] }
 0x323   : > { %1873 = vmatpush1.bf16.msra.mxu1 %v3161_v17  ;;  %v2272_v49 = vunpack.i.h.bf16 %v2270_v2  ;;  %v2271_v51 = vunpack.i.l.bf16 %v2270_v2 }
 0x324   : > { %v881_v13 = vsel %vm878_vm8, %v2251_v42, %v2256_v28  ;;  %v882_v10 = vsel %vm878_vm8, %v2252_v36, %v2257_v33  ;;  %1875 = vmatprep.subr.bf16.mxu1 %v1874_v45 }
 0x325   : > { %v2265_v50 = vpop.permute.xlu1 %2264  ;;  %v2280_v53 = vpop.permute.xlu0 %2279  ;;  %v1770_v60 = vpack.c.bf16 %v882_v10, %v881_v13 }
 0x326   : > { %v2267_v30 = vunpack.i.h.bf16 %v2265_v50  ;;  %v2266_v46 = vunpack.i.l.bf16 %v2265_v50  ;;  %v2282_v19 = vunpack.i.h.bf16 %v2280_v53  ;;  %v2281_v29 = vunpack.i.l.bf16 %v2280_v53 }
 0x327   : > { %1877 = vmatpush1.bf16.msra.mxu1 %v1876_v58  ;;  %1771 = vmatprep.subr.bf16.mxu0 %v1770_v60 }
 0x328   : > { %v879_v4 = vsel %vm878_vm8, %v2256_v28, %v2266_v46  ;;  %v880_v55 = vsel %vm878_vm8, %v2257_v33, %v2267_v30  ;;  %1773 = vmatpush1.bf16.msra.mxu0 %v1772_v61  ;;  %v885_v42 = vsel %vm878_vm8, %v2266_v46, %v2261_v3  ;;  %v886_v26 = vsel %vm878_vm8, %v2267_v30, %v2262_v23  ;;  %v940_v30 = vld [vmem:[%s3127_s3 + $0x18] sm:$0xff] }
 0x329   : > { %v2275_v11 = vpop.permute.xlu1 %2274  ;;  %v2290_v36 = vpop.permute.xlu0 %2289  ;;  %v1880_v56 = vpack.c.bf16 %v880_v55, %v879_v4  ;;  %v908_v33 = vsel %vm903_vm9, %v2281_v29, %v2271_v51  ;;  %v909_v2 = vsel %vm903_vm9, %v2282_v19, %v2272_v49  ;;  %v1878_v28 = vpack.c.bf16 %v886_v26, %v885_v42 }
 0x32a   : > { %v2277_v58 = vunpack.i.h.bf16 %v2275_v11  ;;  %v2276_v17 = vunpack.i.l.bf16 %v2275_v11  ;;  %v1776_v10 = vpack.c.bf16 %v909_v2, %v908_v33  ;;  %v2292_v46 = vunpack.i.h.bf16 %v2290_v36 }
 0x32b   : > { %1017 = vmatmul.mubr.f32.vlgmr.msra.gmra.mrb[4].mxu0 %v937_v7  ;;  %1879 = vmatprep.subr.bf16.mxu1 %v1878_v28 }
 0x32c   : > { %v906_v3 = vsel %vm903_vm9, %v2271_v51, %v2276_v17  ;;  %v907_v23 = vsel %vm903_vm9, %v2272_v49, %v2277_v58  ;;  %1022 = vmatprep.mubr.f32.mxu0 %v942_v47  ;;  %1881 = vmatpush1.bf16.msra.mxu1 %v1880_v56  ;;  %v2291_v49 = vunpack.i.l.bf16 %v2290_v36 }
 0x32d   : > { %v2285_v21 = vpop.permute.xlu1 %2284  ;;  %v2300_v45 = vpop.permute.xlu0 %2299  ;;  %v1774_v13 = vpack.c.bf16 %v907_v23, %v906_v3 }
 0x32e   : > { %v2287_v50 = vunpack.i.h.bf16 %v2285_v21  ;;  %v2286_v53 = vunpack.i.l.bf16 %v2285_v21  ;;  %v2302_v60 = vunpack.i.h.bf16 %v2300_v45  ;;  %v2301_v61 = vunpack.i.l.bf16 %v2300_v45 }
 0x32f   : > { %1775 = vmatprep.subr.bf16.mxu0 %v1774_v13  ;;  %1023 = vmatmul.mubr.f32.gmra.mrb[6].mxu0 %v941_v22 }
 0x330   : > { %v904_v4 = vsel %vm903_vm9, %v2276_v17, %v2286_v53  ;;  %v905_v55 = vsel %vm903_vm9, %v2277_v58, %v2287_v50  ;;  %1777 = vmatpush1.bf16.msra.mxu0 %v1776_v10  ;;  %v910_v42 = vsel %vm903_vm9, %v2286_v53, %v2281_v29  ;;  %v911_v26 = vsel %vm903_vm9, %v2287_v50, %v2282_v19 }
 0x331   : > { %v1884_v51 = vpack.c.bf16 %v905_v55, %v904_v4  ;;  %v2295_v11 = vpop.permute.xlu1 %2294  ;;  %1171 = vmatmul.mubr.f32.vlgmr.msra.gmra.mrb[4].mxu1 %v937_v7  ;;  %v1882_v2 = vpack.c.bf16 %v911_v26, %v910_v42  ;;  %1690 = vmatprep.mubr.msk.f32.mxu0 %vm945_vm10, %v940_v30  ;;  %v933_v58 = vsel %vm928_vm11, %v2301_v61, %v2291_v49 }
 0x332   : > { %v2297_v56 = vunpack.i.h.bf16 %v2295_v11  ;;  %v2296_v33 = vunpack.i.l.bf16 %v2295_v11  ;;  %1176 = vmatprep.mubr.f32.mxu1 %v942_v47  ;;  %v934_v36 = vsel %vm928_vm11, %v2302_v60, %v2292_v46 }
 0x333   : > { %1883 = vmatprep.subr.bf16.mxu1 %v1882_v2  ;;  %v1780_v28 = vpack.c.bf16 %v934_v36, %v933_v58 }
 0x334   : > { %v931_v29 = vsel %vm928_vm11, %v2291_v49, %v2296_v33  ;;  %v932_v19 = vsel %vm928_vm11, %v2292_v46, %v2297_v56  ;;  %1885 = vmatpush1.bf16.msra.mxu1 %v1884_v51 }
 0x335   : > { %v2305_v7 = vpop.permute.xlu1 %2304  ;;  %v1778_v17 = vpack.c.bf16 %v932_v19, %v931_v29  ;;  %1177 = vmatmul.mubr.f32.gmra.mrb[6].mxu1 %v941_v22 }
 0x336   : > { %v2307_v3 = vunpack.i.h.bf16 %v2305_v7  ;;  %v2306_v23 = vunpack.i.l.bf16 %v2305_v7  ;;  %1692 = vmatprep.mubr.msk.f32.mxu1 %vm945_vm10, %v940_v30 }
 0x337   : > { %1779 = vmatprep.subr.bf16.mxu0 %v1778_v17 }
 0x338   : > { %v929_v47 = vsel %vm928_vm11, %v2296_v33, %v2306_v23  ;;  %v930_v21 = vsel %vm928_vm11, %v2297_v56, %v2307_v3  ;;  %1781 = vmatpush1.bf16.msra.mxu0 %v1780_v28  ;;  %v935_v45 = vsel %vm928_vm11, %v2306_v23, %v2301_v61  ;;  %v936_v13 = vsel %vm928_vm11, %v2307_v3, %v2302_v60 }
 0x339   : > { %v1888_v10 = vpack.c.bf16 %v930_v21, %v929_v47  ;;  %1783 = vmatprep.subr.bf16.mxu0 %v2596_v43  ;;  %v1886_v22 = vpack.c.bf16 %v936_v13, %v935_v45  ;;  %v3166_v43 = vmov 0.0  }
 0x33b   : > { %1887 = vmatprep.subr.bf16.mxu1 %v1886_v22 }
 0x33c   : > { %1785 = vmatpush1.bf16.msra.mxu0 %v2567_v18  ;;  %1889 = vmatpush1.bf16.msra.mxu1 %v1888_v10  ;;  %v939_v18 = vld [vmem:[%s3127_s3 + $0x10] sm:$0xff] }
 0x33d   : > { %1787 = vmatprep.subr.bf16.mxu0 %v2631_v25  ;;  %1891 = vmatprep.subr.bf16.mxu1 %v2580_v27  ;;  %v3164_v27 = vld [vmem:[#allocation11_spill] sm:$0xff] }
 0x340   : > { %1789 = vmatpush1.bf16.msra.mxu0 %v2613_v8  ;;  %1893 = vmatpush1.bf16.msra.mxu1 %v2604_v48  ;;  %v3167_v8 = vld [vmem:[#allocation5_spill] sm:$0xff] }
 0x341   : > { %1791 = vmatprep.subr.bf16.mxu0 %v2662_v6  ;;  %1895 = vmatprep.subr.bf16.mxu1 %v2615_v9 }
 0x344   : > { %1793 = vmatpush1.bf16.msra.mxu0 %v2646_v37  ;;  %1897 = vmatpush1.bf16.msra.mxu1 %v2639_v31  ;;  %v3168_v31 = vld [vmem:[#allocation6_spill] sm:$0xff] }
 0x345   : > { %1795 = vmatprep.subr.bf16.mxu0 %v2691_v44  ;;  %1899 = vmatprep.subr.bf16.mxu1 %v2648_v38 }
 0x348   : > { %1797 = vmatpush1.bf16.msra.mxu0 %v2675_v20  ;;  %1901 = vmatpush1.bf16.msra.mxu1 %v2668_v16 }
 0x349   : > { %1799 = vmatprep.subr.bf16.mxu0 %v2720_v59  ;;  %1903 = vmatprep.subr.bf16.mxu1 %v2677_v24  ;;  %v3169_v24 = vld [vmem:[#allocation7_spill] sm:$0xff]  ;;  %v3170_v59 = vld [vmem:[#allocation8_spill] sm:$0xff] }
 0x34c   : > { %1801 = vmatpush1.bf16.msra.mxu0 %v2704_v12  ;;  %1905 = vmatpush1.bf16.msra.mxu1 %v2697_v57 }
 0x34d   : > { %1803 = vmatprep.subr.bf16.mxu0 %v2749_v39  ;;  %1907 = vmatprep.subr.bf16.mxu1 %v2706_v15 }
 0x350   : > { %1805 = vmatpush1.bf16.msra.mxu0 %v2733_v41  ;;  %1909 = vmatpush1.bf16.msra.mxu1 %v2726_v52 }
 0x351   : > { %1807 = vmatprep.subr.bf16.mxu0 %v2778_v0  ;;  %1911 = vmatprep.subr.bf16.mxu1 %v2735_v40  ;;  %v3163_v0 = vld [vmem:[#allocation9_spill] sm:$0xff] }
 0x354   : > { %1809 = vmatpush1.bf16.msra.mxu0 %v2762_v14  ;;  %1913 = vmatpush1.bf16.msra.mxu1 %v2755_v54 }
 0x355   : > { %1811 = vmatprep.subr.bf16.mxu0 %v2807_v63  ;;  %1915 = vmatprep.subr.bf16.mxu1 %v2764_v62  ;;  %v944_v63 = vld [vmem:[%s3127_s3 + $0x38] sm:$0xff] }
 0x358   : > { %1813 = vmatpush1.bf16.msra.mxu0 %v2791_v35  ;;  %1917 = vmatpush1.bf16.msra.mxu1 %v2784_v1  ;;  %v3165_v1 = vld [vmem:[#allocation12_spill] sm:$0xff] }
 0x359   : > { %1815 = vmatprep.subr.bf16.mxu0 %v2836_v32  ;;  %1919 = vmatprep.subr.bf16.mxu1 %v2793_v34  ;;  %v943_v32 = vld [vmem:[%s3127_s3 + $0x30] sm:$0xff] }
 0x35c   : > { %1817 = vmatpush1.bf16.msra.mxu0 %v3162_v5  ;;  %1921 = vmatpush1.bf16.msra.mxu1 %v3163_v0 }
 0x35d   : > { %1923 = vmatprep.subr.bf16.mxu1 %v3164_v27 }
 0x35f   : > { %1094 = vmatmul.mubr.f32.vlgmr.msra.gmra.mrb[4].mxu0 %v939_v18 }
 0x360   : > { %1925 = vmatpush1.bf16.msra.mxu1 %v3165_v1  ;;  %1691 = vmatprep.mubr.msk.f32.mxu0 %vm945_vm10, %v944_v63 }
 0x363   : > { %1100 = vmatmul.mubr.f32.gmra.mrb[6].mxu0 %v943_v32  ;;  %1248 = vmatmul.mubr.f32.vlgmr.msra.gmra.mrb[4].mxu1 %v939_v18 }
 0x364   : > { %1693 = vmatprep.mubr.msk.f32.mxu1 %vm945_vm10, %v944_v63  ;;  %1424 = vmatprep.mubr.f32.mxu0 %v3166_v43 }
 0x367   : > { %1254 = vmatmul.mubr.f32.gmra.mrb[6].mxu1 %v943_v32 }
 0x368   : > { %1501 = vmatprep.mubr.f32.mxu1 %v3166_v43 }
 0x432   : > { %v1095_v48 = vpop.f32.mrb[4].mxu0 }
 0x433   : > { %v1260_v9 = vmul.f32 %v1095_v48, %v3167_v8  ;;  %v1097_v25 = vpop.f32.mrb[5].mxu0 }
 0x434   : > { %v1261_v37 = vmul.f32 %v1097_v25, %v3168_v31 }
 0x436   : > { %v1268_v38 = vadd.f32 %v1261_v37, %v1260_v9  ;;  %v1101_v6 = vpop.f32.mrb[6].mxu0  ;;  %v1249_v16 = vpop.f32.mrb[4].mxu1 }
 0x437   : > { %v1264_v20 = vmul.f32 %v1101_v6, %v3167_v8  ;;  %v1262_v44 = vmul.f32 %v1249_v16, %v3169_v24  ;;  %v1103_v57 = vpop.f32.mrb[7].mxu0  ;;  %v1251_v12 = vpop.f32.mrb[5].mxu1 }
 0x438   : > { %v1265_v15 = vmul.f32 %v1103_v57, %v3168_v31  ;;  %v1263_v52 = vmul.f32 %v1251_v12, %v3170_v59 }
 0x439   : > { %v1269_v41 = vadd.f32 %v1268_v38, %v1262_v44 }
 0x43a   : > { %v1273_v40 = vadd.f32 %v1265_v15, %v1264_v20  ;;  %v1255_v39 = vpop.f32.mrb[6].mxu1 }
 0x43b   : > { %v1266_v54 = vmul.f32 %v1255_v39, %v3169_v24  ;;  %v1257_v14 = vpop.f32.mrb[7].mxu1  ;;  %v1270_v62 = vadd.f32 %v1269_v41, %v1263_v52 }
 0x43c   : > { %v1267_v35 = vmul.f32 %v1257_v14, %v3170_v59 }
 0x43d   : > { %1271 = vadd.xlane.f32.xlu0 %v1270_v62  ;;  %v1274_v34 = vadd.f32 %v1273_v40, %v1266_v54 }
 0x43f   : > { %v1275_v50 = vadd.f32 %v1274_v34, %v1267_v35 }
 0x441   : > { %1276 = vadd.xlane.f32.xlu1 %v1275_v50 }
 0x4ca   : > { %v1272_v53 = vpop.xlane.xlu0 %1271 }
 0x4cb   : > { %v1278_v60 = vmul.f32 0.0046296297, %v1272_v53 }
 0x4cd   : > { %v1280_v61 = vsub.f32 %v1095_v48, %v1278_v60  ;;  %v1281_v30 = vsub.f32 %v1097_v25, %v1278_v60  ;;  %v1282_v46 = vsub.f32 %v1249_v16, %v1278_v60  ;;  %v1283_v4 = vsub.f32 %v1251_v12, %v1278_v60 }
 0x4ce   : > { %v1277_v55 = vpop.xlane.xlu1 %1276 }
 0x4cf   : > { %v1279_v49 = vmul.f32 0.0046296297, %v1277_v55  ;;  %v1288_v51 = vmul.f32 %v1280_v61, %v3167_v8  ;;  %v1289_v11 = vmul.f32 %v1281_v30, %v3168_v31  ;;  %v1290_v42 = vmul.f32 %v1282_v46, %v3169_v24 }
 0x4d0   : > { %v1291_v26 = vmul.f32 %v1283_v4, %v3170_v59 }
 0x4d1   : > { %v1284_v56 = vsub.f32 %v1101_v6, %v1279_v49  ;;  %v1285_v33 = vsub.f32 %v1103_v57, %v1279_v49  ;;  %v1296_v2 = vmul.f32 %v1288_v51, %v1288_v51  ;;  %v1297_v58 = vmul.f32 %v1289_v11, %v1289_v11 }
 0x4d2   : > { %v1286_v36 = vsub.f32 %v1255_v39, %v1279_v49  ;;  %v1287_v29 = vsub.f32 %v1257_v14, %v1279_v49  ;;  %v1298_v19 = vmul.f32 %v1290_v42, %v1290_v42  ;;  %v1299_v3 = vmul.f32 %v1291_v26, %v1291_v26  ;;  %v1352_v26 = vld [vmem:[%s3128_s4] sm:$0xff] }
 0x4d3   : > { %v1304_v7 = vadd.f32 %v1297_v58, %v1296_v2  ;;  %v1292_v17 = vmul.f32 %v1284_v56, %v3167_v8  ;;  %v1293_v28 = vmul.f32 %v1285_v33, %v3168_v31 }
 0x4d4   : > { %v1294_v23 = vmul.f32 %v1286_v36, %v3169_v24  ;;  %v1295_v21 = vmul.f32 %v1287_v29, %v3170_v59 }
 0x4d5   : > { %v1305_v47 = vadd.f32 %v1304_v7, %v1298_v19  ;;  %v1300_v45 = vmul.f32 %v1292_v17, %v1292_v17  ;;  %v1301_v13 = vmul.f32 %v1293_v28, %v1293_v28 }
 0x4d6   : > { %v1302_v22 = vmul.f32 %v1294_v23, %v1294_v23  ;;  %v1303_v0 = vmul.f32 %v1295_v21, %v1295_v21 }
 0x4d7   : > { %v1306_v10 = vadd.f32 %v1305_v47, %v1299_v3  ;;  %v1309_v5 = vadd.f32 %v1301_v13, %v1300_v45 }
 0x4d9   : > { %1307 = vadd.xlane.f32.xlu0 %v1306_v10  ;;  %v1310_v18 = vadd.f32 %v1309_v5, %v1302_v22 }
 0x4db   : > { %v1311_v27 = vadd.f32 %v1310_v18, %v1303_v0 }
 0x4dd   : > { %1312 = vadd.xlane.f32.xlu0 %v1311_v27 }
 0x566   : > { %v1308_v63 = vpop.xlane.xlu0 %1307 }
 0x567   : > { %v1314_v1 = vmul.f32 0.0046296297, %v1308_v63 }
 0x569   : > { %v1316_v32 = vadd.f32 1e-05, %v1314_v1 }
 0x56a   : > { %v1313_v48 = vpop.xlane.xlu0 %1312 }
 0x56b   : > { %2312 = vrsqrt.f32 %v1316_v32  ;;  %v1315_v9 = vmul.f32 0.0046296297, %v1313_v48 }
 0x56d   : > { %v1317_v25 = vadd.f32 1e-05, %v1315_v9 }
 0x56f   : > { %2314 = vrsqrt.f32 %v1317_v25 }
 0x575   : > { %v2313_v37 = vpop.eup %2312 }
 0x576   : > { %v1321_v38 = vmul.f32 %v2313_v37, %v1281_v30  ;;  %v1323_v6 = vmul.f32 %v2313_v37, %v1283_v4  ;;  %v1320_v16 = vmul.f32 %v2313_v37, %v1280_v61  ;;  %v1322_v20 = vmul.f32 %v2313_v37, %v1282_v46 }
 0x578   : > { %vm1329_vm12 = vcmp.ge.f32.partialorder %v1321_v38, 0.0  ;;  %v1337_v44 = vmul.f32 0.01, %v1321_v38  ;;  %vm1331_vm13 = vcmp.ge.f32.partialorder %v1323_v6, 0.0  ;;  %v1339_v57 = vmul.f32 0.01, %v1323_v6 }
 0x579   : > { %v2315_v12 = vpop.eup %2314  ;;  %vm1328_vm14 = vcmp.ge.f32.partialorder %v1320_v16, 0.0  ;;  %v1336_v15 = vmul.f32 0.01, %v1320_v16  ;;  %vm1330_vm15 = vcmp.ge.f32.partialorder %v1322_v20, 0.0  ;;  %v1338_v40 = vmul.f32 0.01, %v1322_v20 }
 0x57a   : > { %v1325_v52 = vmul.f32 %v2315_v12, %v1285_v33  ;;  %v1327_v41 = vmul.f32 %v2315_v12, %v1287_v29  ;;  %v1345_v39 = vsel %vm1329_vm12, %v1321_v38, %v1337_v44  ;;  %v1347_v54 = vsel %vm1331_vm13, %v1323_v6, %v1339_v57 }
 0x57b   : > { %v1324_v14 = vmul.f32 %v2315_v12, %v1284_v56  ;;  %v1326_v62 = vmul.f32 %v2315_v12, %v1286_v36  ;;  %v1344_v30 = vsel %vm1328_vm14, %v1320_v16, %v1336_v15  ;;  %v1346_v46 = vsel %vm1330_vm15, %v1322_v20, %v1338_v40  ;;  %v1353_v56 = vld [vmem:[%s3128_s4 + $0x8] sm:$0xff] }
 0x57c   : > { %vm1333_vm1 = vcmp.ge.f32.partialorder %v1325_v52, 0.0  ;;  %v1341_v35 = vmul.f32 0.01, %v1325_v52  ;;  %vm1335_vm2 = vcmp.ge.f32.partialorder %v1327_v41, 0.0  ;;  %v1343_v34 = vmul.f32 0.01, %v1327_v41 }
 0x57d   : > { %vm1332_vm3 = vcmp.ge.f32.partialorder %v1324_v14, 0.0  ;;  %v1340_v50 = vmul.f32 0.01, %v1324_v14  ;;  %vm1334_vm4 = vcmp.ge.f32.partialorder %v1326_v62, 0.0  ;;  %v1342_v53 = vmul.f32 0.01, %v1326_v62 }
 0x57e   : > { %v1349_v60 = vsel %vm1333_vm1, %v1325_v52, %v1341_v35  ;;  %v1351_v61 = vsel %vm1335_vm2, %v1327_v41, %v1343_v34 }
 0x57f   : > { %v1926_v4 = vpack.c.bf16 %v1349_v60, %v1345_v39  ;;  %v1930_v55 = vpack.c.bf16 %v1351_v61, %v1347_v54  ;;  %v1348_v49 = vsel %vm1332_vm3, %v1324_v14, %v1340_v50  ;;  %v1350_v51 = vsel %vm1334_vm4, %v1326_v62, %v1342_v53 }
 0x580   : > { %v1928_v11 = vpack.c.bf16 %v1348_v49, %v1344_v30  ;;  %v1932_v42 = vpack.c.bf16 %v1350_v51, %v1346_v46 }
 0x581   : > { %1927 = vmatprep.subr.bf16.mxu0 %v1926_v4  ;;  %1931 = vmatprep.subr.bf16.mxu1 %v1930_v55 }
 0x582   : > { %1929 = vmatpush1.bf16.msra.mxu0 %v1928_v11  ;;  %1933 = vmatpush1.bf16.msra.mxu1 %v1932_v42 }
 0x585   : > { %1694 = vmatmul.mubr.msk.f32.vlgmr.msra.gmra.mrb[8].mxu0 %vm236_vm0, %v1352_v26  ;;  %1696 = vmatmul.mubr.msk.f32.vlgmr.msra.gmra.mrb[8].mxu1 %vm236_vm0, %v1352_v26 }
 0x586   : > { %1430 = vmatprep.mubr.f32.mxu0 %v3166_v43  ;;  %1507 = vmatprep.mubr.f32.mxu1 %v3166_v43 }
 0x589   : > { %1695 = vmatmul.mubr.msk.f32.gmra.mrb[10].mxu0 %vm236_vm0, %v1353_v56  ;;  %1697 = vmatmul.mubr.msk.f32.gmra.mrb[10].mxu1 %vm236_vm0, %v1353_v56 }
 0x658   : > { %v1426_v33 = vpop.f32.mrb[8].mxu0  ;;  %v1503_v2 = vpop.f32.mrb[8].mxu1 }
 0x659   : > { %v1514_v58 = vmul.f32 %v1426_v33, %v3167_v8  ;;  %v1428_v36 = vpop.f32.mrb[9].mxu0  ;;  %v1505_v29 = vpop.f32.mrb[9].mxu1  ;;  %v1516_v7 = vmul.f32 %v1503_v2, %v3169_v24 }
 0x65a   : > { %v1515_v19 = vmul.f32 %v1428_v36, %v3168_v31  ;;  %v1517_v45 = vmul.f32 %v1505_v29, %v3170_v59 }
 0x65c   : > { %v1522_v17 = vadd.f32 %v1515_v19, %v1514_v58  ;;  %v1432_v28 = vpop.f32.mrb[10].mxu0  ;;  %v1509_v3 = vpop.f32.mrb[10].mxu1  ;;  %v2321_v19 = vld [vmem:[%s2399_s23 + $0x8] sm:$0xff] }
 0x65d   : > { %v1518_v23 = vmul.f32 %v1432_v28, %v3167_v8  ;;  %v1434_v43 = vpop.f32.mrb[11].mxu0  ;;  %v1511_v47 = vpop.f32.mrb[11].mxu1  ;;  %v1520_v13 = vmul.f32 %v1509_v3, %v3169_v24 }
 0x65e   : > { %v1519_v21 = vmul.f32 %v1434_v43, %v3168_v31  ;;  %v1523_v10 = vadd.f32 %v1522_v17, %v1516_v7  ;;  %v1521_v0 = vmul.f32 %v1511_v47, %v3170_v59  ;;  %v2322_v17 = vld [vmem:[%s2399_s23 + $0x10] sm:$0xff] }
 0x660   : > { %v1527_v22 = vadd.f32 %v1519_v21, %v1518_v23  ;;  %v1524_v5 = vadd.f32 %v1523_v10, %v1517_v45 }
 0x662   : > { %1525 = vadd.xlane.f32.xlu0 %v1524_v5  ;;  %v1528_v18 = vadd.f32 %v1527_v22, %v1520_v13 }
 0x664   : > { %v1529_v27 = vadd.f32 %v1528_v18, %v1521_v0 }
 0x666   : > { %1530 = vadd.xlane.f32.xlu1 %v1529_v27 }
 0x6ef   : > { %v1526_v63 = vpop.xlane.xlu0 %1525 }
 0x6f0   : > { %v1532_v1 = vmul.f32 0.0046296297, %v1526_v63 }
 0x6f2   : > { %v1534_v32 = vsub.f32 %v1426_v33, %v1532_v1  ;;  %v1535_v48 = vsub.f32 %v1428_v36, %v1532_v1  ;;  %v1536_v9 = vsub.f32 %v1503_v2, %v1532_v1  ;;  %v1537_v25 = vsub.f32 %v1505_v29, %v1532_v1  ;;  %v2320_v36 = vld [vmem:[%s2399_s23] sm:$0xff] }
 0x6f3   : > { %v1531_v37 = vpop.xlane.xlu1 %1530  ;;  %v2324_v1 = vld [vmem:[%s2399_s23 + $0x20] sm:$0xff] }
 0x6f4   : > { %v1533_v38 = vmul.f32 0.0046296297, %v1531_v37  ;;  %v1542_v6 = vmul.f32 %v1534_v32, %v3167_v8  ;;  %v1543_v16 = vmul.f32 %v1535_v48, %v3168_v31  ;;  %v1544_v20 = vmul.f32 %v1536_v9, %v3169_v24  ;;  %v3172_v37 = vld [vmem:[#allocation4_spill] sm:$0xff] }
 0x6f5   : > { %v1545_v44 = vmul.f32 %v1537_v25, %v3170_v59 }
 0x6f6   : > { %v1538_v57 = vsub.f32 %v1432_v28, %v1533_v38  ;;  %v1539_v12 = vsub.f32 %v1434_v43, %v1533_v38  ;;  %v1550_v15 = vmul.f32 %v1542_v6, %v1542_v6  ;;  %v1551_v52 = vmul.f32 %v1543_v16, %v1543_v16  ;;  %v3173_v6 = vld [vmem:[#allocation3_spill] sm:$0xff] }
 0x6f7   : > { %v1540_v41 = vsub.f32 %v1509_v3, %v1533_v38  ;;  %v1541_v40 = vsub.f32 %v1511_v47, %v1533_v38  ;;  %v1552_v39 = vmul.f32 %v1544_v20, %v1544_v20  ;;  %v1553_v35 = vmul.f32 %v1545_v44, %v1545_v44  ;;  %v2323_v3 = vld [vmem:[%s2399_s23 + $0x18] sm:$0xff] }
 0x6f8   : > { %v1558_v54 = vadd.f32 %v1551_v52, %v1550_v15  ;;  %v1546_v14 = vmul.f32 %v1538_v57, %v3167_v8  ;;  %v1547_v62 = vmul.f32 %v1539_v12, %v3168_v31 }
 0x6f9   : > { %v1548_v34 = vmul.f32 %v1540_v41, %v3169_v24  ;;  %v1549_v53 = vmul.f32 %v1541_v40, %v3170_v59 }
 0x6fa   : > { %v1559_v50 = vadd.f32 %v1558_v54, %v1552_v39  ;;  %v1554_v60 = vmul.f32 %v1546_v14, %v1546_v14  ;;  %v1555_v61 = vmul.f32 %v1547_v62, %v1547_v62 }
 0x6fb   : > { %v1556_v46 = vmul.f32 %v1548_v34, %v1548_v34  ;;  %v1557_v55 = vmul.f32 %v1549_v53, %v1549_v53 }
 0x6fc   : > { %v1560_v30 = vadd.f32 %v1559_v50, %v1553_v35  ;;  %v1563_v4 = vadd.f32 %v1555_v61, %v1554_v60 }
 0x6fe   : > { %1561 = vadd.xlane.f32.xlu0 %v1560_v30  ;;  %v1564_v49 = vadd.f32 %v1563_v4, %v1556_v46 }
 0x700   : > { %v1565_v51 = vadd.f32 %v1564_v49, %v1557_v55 }
 0x702   : > { %1566 = vadd.xlane.f32.xlu1 %v1565_v51 }
 0x78b   : > { %v1562_v8 = vpop.xlane.xlu0 %1561 }
 0x78c   : > { %v1568_v31 = vmul.f32 0.0046296297, %v1562_v8 }
 0x78e   : > { %v1570_v11 = vadd.f32 1e-05, %v1568_v31 }
 0x78f   : > { %v1567_v24 = vpop.xlane.xlu1 %1566 }
 0x790   : > { %2316 = vrsqrt.f32 %v1570_v11  ;;  %v1569_v59 = vmul.f32 0.0046296297, %v1567_v24 }
 0x792   : > { %v1571_v42 = vadd.f32 1e-05, %v1569_v59 }
 0x794   : > { %2318 = vrsqrt.f32 %v1571_v42 }
 0x79a   : > { %v2317_v26 = vpop.eup %2316 }
 0x79b   : > { %v1574_v56 = vmul.f32 %v2317_v26, %v1534_v32  ;;  %v1575_v33 = vmul.f32 %v2317_v26, %v1535_v48  ;;  %v1576_v2 = vmul.f32 %v2317_v26, %v1536_v9  ;;  %v1577_v58 = vmul.f32 %v2317_v26, %v1537_v25  ;;  %v3171_v9 = vld [vmem:[#allocation2_spill] sm:$0xff] }
 0x79d   : > { %v1582_v29 = vadd.f32 %v2320_v36, %v1574_v56  ;;  %v1583_v7 = vadd.f32 %v2321_v19, %v1575_v33  ;;  %v1584_v28 = vadd.f32 %v2322_v17, %v1576_v2  ;;  %v1585_v23 = vadd.f32 %v2323_v3, %v1577_v58 }
 0x79e   : > { %v2319_v43 = vpop.eup %2318 }
 0x79f   : > { %vm1590_vm0 = vcmp.ge.f32.partialorder %v1582_v29, 0.0  ;;  %vm1591_vm5 = vcmp.ge.f32.partialorder %v1583_v7, 0.0  ;;  %vm1592_vm6 = vcmp.ge.f32.partialorder %v1584_v28, 0.0  ;;  %vm1593_vm7 = vcmp.ge.f32.partialorder %v1585_v23, 0.0 }
 0x7a0   : > { %v1598_v47 = vmul.f32 0.01, %v1582_v29  ;;  %v1599_v21 = vmul.f32 0.01, %v1583_v7  ;;  %v1600_v45 = vmul.f32 0.01, %v1584_v28  ;;  %v1578_v13 = vmul.f32 %v2319_v43, %v1538_v57 }
 0x7a1   : > { %v1601_v10 = vmul.f32 0.01, %v1585_v23  ;;  %v1579_v22 = vmul.f32 %v2319_v43, %v1539_v12  ;;  %v1580_v5 = vmul.f32 %v2319_v43, %v1540_v41  ;;  %v1581_v0 = vmul.f32 %v2319_v43, %v1541_v40 }
 0x7a2   : > { %v1606_v18 = vsel %vm1590_vm0, %v1582_v29, %v1598_v47  ;;  %v1607_v27 = vsel %vm1591_vm5, %v1583_v7, %v1599_v21  ;;  %v1608_v63 = vsel %vm1592_vm6, %v1584_v28, %v1600_v45  ;;  %v1586_v32 = vadd.f32 %v2324_v1, %v1578_v13 }
 0x7a3   : > { %v1609_v48 = vsel %vm1593_vm7, %v1585_v23, %v1601_v10  ;;  %1614 = vst [vmem:[%s3107_s27] sm:$0xff] %v1606_v18  ;;  %1615 = vst [vmem:[%s3107_s27 + $0x8] sm:$0xff] %v1607_v27  ;;  %v1587_v25 = vadd.f32 %v1579_v22, %v3171_v9  ;;  %v1588_v38 = vadd.f32 %v1580_v5, %v3172_v37 }
 0x7a4   : > { %1616 = vst [vmem:[%s3107_s27 + $0x10] sm:$0xff] %v1608_v63  ;;  %v1589_v16 = vadd.f32 %v1581_v0, %v3173_v6  ;;  %1617 = vst [vmem:[%s3107_s27 + $0x18] sm:$0xff] %v1609_v48  ;;  %vm1594_vm8 = vcmp.ge.f32.partialorder %v1586_v32, 0.0  ;;  %v1602_v20 = vmul.f32 0.01, %v1586_v32 }
 0x7a5   : > { %vm1595_vm9 = vcmp.ge.f32.partialorder %v1587_v25, 0.0  ;;  %vm1596_vm10 = vcmp.ge.f32.partialorder %v1588_v38, 0.0  ;;  %v1603_v44 = vmul.f32 0.01, %v1587_v25  ;;  %v1604_v57 = vmul.f32 0.01, %v1588_v38 }
 0x7a6   : > { %vm1597_vm11 = vcmp.ge.f32.partialorder %v1589_v16, 0.0  ;;  %v1605_v12 = vmul.f32 0.01, %v1589_v16  ;;  %v1610_v15 = vsel %vm1594_vm8, %v1586_v32, %v1602_v20 }
 0x7a7   : > { %v1611_v52 = vsel %vm1595_vm9, %v1587_v25, %v1603_v44  ;;  %1618 = vst [vmem:[%s3107_s27 + $0x20] sm:$0xff] %v1610_v15  ;;  %v1612_v41 = vsel %vm1596_vm10, %v1588_v38, %v1604_v57 }
 0x7a8   : > { %v1613_v40 = vsel %vm1597_vm11, %v1589_v16, %v1605_v12  ;;  %1619 = vst [vmem:[%s3107_s27 + $0x28] sm:$0xff] %v1611_v52  ;;  %1620 = vst [vmem:[%s3107_s27 + $0x30] sm:$0xff] %v1612_v41 }
 0x7a9   : > { %1621 = vst [vmem:[%s3107_s27 + $0x38] sm:$0xff] %v1613_v40 }
 0x7aa PF: > { %s15_s18 = sadd.s32 1, %s2331_s18  }
 0x7ab   : > { %p12_p4 = scmp.ge.s32.totalorder %s15_s18, 4  }
 0x7ad   :  { %14 = sbr.rel (!%p12_p4) target bundleno = 1 (0x1), region = 70 }

</bundles_post_ra>
